<compile_context>
chip_gen: v6e
topology: v6e:2x2x1
jax: 0.10.0
libtpu: 0.0.40
codegen_flags: <defaults>
</compile_context>

<pallas_src>
import numpy as np
import jax
import jax.numpy as jnp
from jax import lax
from jax.experimental import pallas as pl
from jax.experimental.pallas import tpu as pltpu


def _round_up(x, m):
    return ((x + m - 1) // m) * m


def _pad2(a, rows, cols):
    r, c = a.shape
    if r == rows and c == cols:
        return a
    return jnp.pad(a, ((0, rows - r), (0, cols - c)))


def _pick_row_tiling(n, tile_m):
    nm = _round_up(max(n, 1), 128)
    tm = min(tile_m, nm)
    # v7x shards the leading "parallel" grid axis across its 2 TensorCores:
    # keep at least two row tiles whenever there is enough work for two.
    if nm // tm < 2 and nm >= 256:
        tm = max(128, _round_up(nm // 2, 128))
    nm = _round_up(nm, tm)
    return nm, tm


def _bucket_edges_by_row_tile(src, dst, w, num_tiles, tm, ec):
    """Host-side CSR-style preprocessing: sort edges by dst, bucket per output
    row tile and pad each bucket to a whole number of Ec-sized chunks.

    Returns:
      src_p : (T, cap)        int32   source node of each (padded) edge slot
      w_p   : (T, cap)        float32 edge weight (0 for padding)
      dstl_p: (T, cpt*8, Ec)  int32   local dst row per edge, stored in sublane
                                      row c*8 of each chunk slab (-1 = padding)
      cnt   : (T, cpt)        int32   #real edges per chunk
      blk   : (T, cpt)        int32   chunk block actually fetched (skips DMA
                                      for trailing all-padding chunks)
      cpt   : chunks per tile
    """
    src = np.asarray(src, np.int64)
    dst = np.asarray(dst, np.int64)
    w = np.asarray(w, np.float32)

    order = np.argsort(dst, kind="stable")
    src, dst, w = src[order], dst[order], w[order]
    tile = dst // tm
    counts = np.bincount(tile, minlength=num_tiles).astype(np.int64)
    max_cnt = int(counts.max()) if counts.size else 0
    cpt = max(1, -(-max_cnt // ec))
    cap = cpt * ec

    src_p = np.zeros((num_tiles, cap), np.int32)
    w_p = np.zeros((num_tiles, cap), np.float32)
    dstl_p = np.full((num_tiles, cpt * 8, ec), -1, np.int32)
    cnt = np.zeros((num_tiles, cpt), np.int32)
    blk = np.zeros((num_tiles, cpt), np.int32)

    offsets = np.concatenate([[0], np.cumsum(counts)])
    for t in range(num_tiles):
        s, e = int(offsets[t]), int(offsets[t + 1])
        k = e - s
        src_p[t, :k] = src[s:e]
        w_p[t, :k] = w[s:e]
        loc = np.full((cap,), -1, np.int64)
        loc[:k] = dst[s:e] - t * tm
        dstl_p[t, 0::8, :] = loc.reshape(cpt, ec)       # sublane row 0 of slab c
        per = np.zeros((cpt,), np.int32)
        full_chunks = k // ec
        rem = k - full_chunks * ec
        per[:full_chunks] = ec
        if rem and full_chunks < cpt:
            per[full_chunks] = rem
        cnt[t] = per
        n_nz = max(int(np.count_nonzero(per)), 1)
        blk[t] = np.minimum(np.arange(cpt), n_nz - 1)   # re-use resident block
    return src_p, w_p, dstl_p, cnt, blk, cpt


def linkx_wl_spmm_kernel(cnt_ref, blk_ref,               # scalar-prefetch (SMEM)
                         g_ref, dstl_ref, xcat_ref,
                         wn_ref, b_ref, wf_ref, bf_ref,
                         y_ref,
                         acc_ref):
    """Grid = (row_tiles, edge_chunks_per_tile);  reduction axis (chunks) last.

    g_ref   : (1, Ec, H)  bf16   w_e * We'[src_e] rows of the fetched chunk
    dstl_ref: (1, 8, Ec)  int32  sublane row 0 = local dst row per edge (-1 pad)
    xcat_ref: (tm, Din)   f32    concat(x, wl_emb) rows of this row tile
    wn_ref  : (Din, H)    f32    folded node weight  Wn' = Wn (I + Wc2)
    b_ref   : (1, H)      f32    folded bias b'
    wf_ref  : (H, Cp), bf_ref: (1, Cp)    final linear (output lane-padded)
    acc_ref : (tm, H)     f32    VMEM scratch accumulator over edge chunks
    """
    i = pl.program_id(0)
    c = pl.program_id(1)

    @pl.when(c == 0)
    def _():
        acc_ref[...] = jnp.zeros_like(acc_ref)

    # Edge-list SpMM step: scatter-add this chunk's weighted We' rows into
    # their destination rows via a one-hot (tm, Ec) matmul on the MXU.
    # All-padding chunks skip both the DMA (index_map) and this accumulate.
    @pl.when(cnt_ref[i, c] > 0)
    def _():
        tm = acc_ref.shape[0]
        dst_local = dstl_ref[0][:1, :]                           # (1, Ec) int32
        ec = dst_local.shape[-1]
        rows = lax.broadcasted_iota(jnp.int32, (tm, ec), 0)
        scatter = jnp.where(rows == dst_local, 1.0, 0.0).astype(jnp.bfloat16)
        acc_ref[...] += jnp.dot(scatter, g_ref[0],
                                preferred_element_type=jnp.float32)

    @pl.when(c == pl.num_programs(1) - 1)
    def _():
        # Once-per-row-tile epilogue (kept f32): node path + folded bias,
        # relu, final linear, lane-dense store.
        pre = (acc_ref[...]
               + jnp.dot(xcat_ref[...], wn_ref[...],
                         preferred_element_type=jnp.float32)
               + b_ref[...])
        pre = jnp.maximum(pre, 0.0)
        y_ref[...] = (jnp.dot(pre, wf_ref[...],
                              preferred_element_type=jnp.float32)
                      + bf_ref[...]).astype(y_ref.dtype)


def linkx_wl_forward(wl_indices, x, edge_src, edge_dst, edge_weight,
                     params, emb_table, *, tile_m=256, edge_chunk=512):
    """LINKX_WL forward (single-layer / dropout=0 config).  The edge-list SpMM,
    the folded linear chain and the fused MLP epilogue run in one Pallas
    kernel; edge sorting/bucketing is host-side data preprocessing."""
    we, be, wc1, bc1, wn, bn, wc2, bc2, wf, bf = params
    n = x.shape[0]
    h = we.shape[1]
    c_out = wf.shape[1]

    # nn.Embedding lookup + torch.cat((x, wl_emb), dim=1)  (cheap glue).
    xcat = jnp.concatenate([x, emb_table[wl_indices]], axis=1)
    din = xcat.shape[1]

    # ---- one-time algebraic fold of cat_lin1 / cat_lin2.
    # NOTE: only valid for num_edge_layers=num_node_layers=num_layers=1, p=0.
    eye = jnp.eye(h, dtype=jnp.float32)
    m1 = eye + wc1
    m2 = eye + wc2
    we_f = we @ m1                                  # (N, H)
    wn_f = wn @ m2                                  # (din, H)
    b_f = be @ m1 + bc1 + bn @ m2 + bc2             # (1, H)

    # ---- tiling (>= 2 row tiles when possible, for v7x's two TensorCores) ----
    nm, tm = _pick_row_tiling(n, tile_m)
    num_tiles = nm // tm
    ec = edge_chunk
    cp = _round_up(c_out, 128)                      # lane-dense output

    # ---- host-side edge bucketing (sort by dst, pad per tile to Ec chunks) ----
    src_p, w_p, dstl_p, cnt, blk, cpt = _bucket_edges_by_row_tile(
        jax.device_get(edge_src), jax.device_get(edge_dst),
        jax.device_get(edge_weight), num_tiles, tm, ec)

    # ---- wrapper-side gather of folded, weighted edge rows (O(nnz*H)):
    #      g[t, e, :] = w_e * We'[src_e, :]  -> dominant HBM stream, bf16.
    g = (we_f[jnp.asarray(src_p)] * jnp.asarray(w_p)[..., None]
         ).astype(jnp.bfloat16)                     # (T, cpt*Ec, H)

    xcat_p = _pad2(xcat.astype(jnp.float32), nm, din)
    wf_p = _pad2(wf, h, cp)
    bf_p = _pad2(bf, 1, cp)

    y = pl.pallas_call(
        linkx_wl_spmm_kernel,
        out_shape=jax.ShapeDtypeStruct((nm, cp), jnp.float32),
        grid_spec=pltpu.PrefetchScalarGridSpec(
            num_scalar_prefetch=2,                  # (cnt, blk) -> SMEM
            grid=(num_tiles, cpt),
            in_specs=[
                # Gathered edge rows; empty trailing chunks re-fetch the
                # previous (resident) block so their DMA is skipped.
                pl.BlockSpec((1, ec, h), lambda i, c, nz, bm: (i, bm[i, c], 0)),
                # Local dst row ids for the same chunk (8-sublane slab).
                pl.BlockSpec((1, 8, ec), lambda i, c, nz, bm: (i, bm[i, c], 0)),
                pl.BlockSpec((tm, din), lambda i, c, nz, bm: (i, 0)),
                pl.BlockSpec((din, h), lambda i, c, nz, bm: (0, 0)),
                pl.BlockSpec((1, h), lambda i, c, nz, bm: (0, 0)),
                pl.BlockSpec((h, cp), lambda i, c, nz, bm: (0, 0)),
                pl.BlockSpec((1, cp), lambda i, c, nz, bm: (0, 0)),
            ],
            out_specs=pl.BlockSpec((tm, cp), lambda i, c, nz, bm: (i, 0)),
            scratch_shapes=[pltpu.VMEM((tm, h), jnp.float32)],
        ),
        compiler_params=pltpu.CompilerParams(
            dimension_semantics=("parallel", "arbitrary"),
        ),
    )(jnp.asarray(cnt), jnp.asarray(blk), g, jnp.asarray(dstl_p),
      xcat_p, wn_f, b_f, wf_p, bf_p)

    return y[:n, :c_out]


def make_params(key, num_nodes, in_channels, hidden, out_channels,
                wl_emb_dim, num_wl):
    ks = jax.random.split(key, 6)

    def lin(kw, fan_in, fan_out):
        bound = 1.0 / np.sqrt(fan_in)
        w = jax.random.uniform(kw, (fan_in, fan_out), jnp.float32, -bound, bound)
        b = jax.random.uniform(jax.random.fold_in(kw, 1), (1, fan_out),
                               jnp.float32, -bound, bound)
        return w, b

    we, be = lin(ks[0], num_nodes, hidden)                     # edge_lin (SparseLinear)
    wc1, bc1 = lin(ks[1], hidden, hidden)                      # cat_lin1
    wn, bn = lin(ks[2], in_channels + wl_emb_dim, hidden)      # node_mlp
    wc2, bc2 = lin(ks[3], hidden, hidden)                      # cat_lin2
    wf, bf = lin(ks[4], hidden, out_channels)                  # final_mlp
    emb = jax.random.normal(ks[5], (num_wl, wl_emb_dim), jnp.float32)
    return (we, be, wc1, bc1, wn, bn, wc2, bc2, wf, bf), emb


if __name__ == "__main__":
    num_nodes = 256
    in_channels = 16
    hidden = 32
    out_channels = 8
    wl_emb_dim = 8
    num_wl = 10
    num_edges = 512

    key = jax.random.PRNGKey(0)
    k_p, k_x, k_wl, k_src, k_dst, k_ew = jax.random.split(key, 6)

    params, emb_table = make_params(k_p, num_nodes, in_channels, hidden,
                                    out_channels, wl_emb_dim, num_wl)

    x = jax.random.normal(k_x, (num_nodes, in_channels), jnp.float32)
    wl_indices = jax.random.randint(k_wl, (num_nodes,), 0, num_wl)
    src = jax.random.randint(k_src, (num_edges,), 0, num_nodes)
    dst = jax.random.randint(k_dst, (num_edges,), 0, num_nodes)
    edge_weight = jax.random.uniform(k_ew, (num_edges,), jnp.float32, 0.1, 1.0)

    y = linkx_wl_forward(wl_indices, x, src, dst, edge_weight, params, emb_table)
    y = jax.block_until_ready(y)

    # ---- pure-JAX f32 reference of the original (unfolded) forward; it also
    #      never materializes the dense N x N adjacency.
    we, be, wc1, bc1, wn, bn, wc2, bc2, wf, bf = params
    e = jnp.zeros((num_nodes, hidden), jnp.float32)
    e = e.at[dst].add(edge_weight[:, None] * we[src]) + be       # SparseLinear
    out = e + (e @ wc1 + bc1)                                    # + cat_lin1
    xcat = jnp.concatenate([x, emb_table[wl_indices]], axis=1)
    xn = xcat @ wn + bn                                          # node_mlp
    out = out + xn + (xn @ wc2 + bc2)                            # + cat_lin2
    ref = jnp.maximum(out, 0.0) @ wf + bf                        # final_mlp

    assert y.shape == (num_nodes, out_channels)
    # Tolerance covers the deliberate bf16 cast of the gathered edge stream.
    np.testing.assert_allclose(np.asarray(y), np.asarray(ref),
                               rtol=2e-2, atol=2e-2)
    print("KERNEL_OK")
</pallas_src>

<mosaic_0001>
module attributes {stable_mosaic.version = 11 : i64} {
  func.func @linkx_wl_spmm_kernel(%arg0: i32, %arg1: i32, %arg2: memref<2x1xi32, #tpu.memory_space<smem>>, %arg3: memref<2x1xi32, #tpu.memory_space<smem>>, %arg4: memref<1x512x32xbf16, #tpu.memory_space<vmem>>, %arg5: memref<1x8x512xi32, #tpu.memory_space<vmem>>, %arg6: memref<128x24xf32, #tpu.memory_space<vmem>>, %arg7: memref<24x32xf32, #tpu.memory_space<vmem>>, %arg8: memref<1x32xf32, #tpu.memory_space<vmem>>, %arg9: memref<32x128xf32, #tpu.memory_space<vmem>>, %arg10: memref<1x128xf32, #tpu.memory_space<vmem>>, %arg11: memref<128x128xf32, #tpu.memory_space<vmem>>, %arg12: memref<128x32xf32, #tpu.memory_space<vmem>>) attributes {dimension_semantics = [#tpu.dimension_semantics<parallel>, #tpu.dimension_semantics<arbitrary>], iteration_bounds = array<i64: 2, 1>, scalar_prefetch = 2 : i64, scratch_operands = 1 : i64, tpu.core_type = #tpu.core_type<tc>, window_params = [{transform_indices = @transform_0, window_bounds = array<i64: 1, 512, 32>}, {transform_indices = @transform_1, window_bounds = array<i64: 1, 8, 512>}, {transform_indices = @transform_2, window_bounds = array<i64: 128, 24>}, {pipeline_mode = #tpu.pipeline_mode<synchronous>, transform_indices = @transform_3, window_bounds = array<i64: 24, 32>}, {pipeline_mode = #tpu.pipeline_mode<synchronous>, transform_indices = @transform_4, window_bounds = array<i64: 1, 32>}, {pipeline_mode = #tpu.pipeline_mode<synchronous>, transform_indices = @transform_5, window_bounds = array<i64: 32, 128>}, {pipeline_mode = #tpu.pipeline_mode<synchronous>, transform_indices = @transform_6, window_bounds = array<i64: 1, 128>}, {transform_indices = @transform_7, window_bounds = array<i64: 128, 128>}]} {
    %c0_i32 = arith.constant 0 : i32
    %0 = arith.cmpi eq, %arg1, %c0_i32 : i32
    %1 = arith.extui %0 : i1 to i32
    %c0_i32_0 = arith.constant 0 : i32
    %2 = arith.cmpi ne, %1, %c0_i32_0 : i32
    scf.if %2 {
      %cst = arith.constant 0.000000e+00 : f32
      %12 = vector.broadcast %cst : f32 to vector<128x32xf32>
      %c0 = arith.constant 0 : index
      %c0_5 = arith.constant 0 : index
      %13 = vector.load %arg12[%c0, %c0_5] : memref<128x32xf32, #tpu.memory_space<vmem>>, vector<128x32xf32>
      tpu.vector_store %arg12[%c0, %c0_5], %12 {strides = array<i32>} : memref<128x32xf32, #tpu.memory_space<vmem>>, vector<128x32xf32>,
    } else {
    }
    %3 = arith.index_cast %arg0 : i32 to index
    %4 = arith.index_cast %arg1 : i32 to index
    %5 = memref.load %arg2[%3, %4] : memref<2x1xi32, #tpu.memory_space<smem>>
    %c0_i32_1 = arith.constant 0 : i32
    %6 = arith.cmpi sgt, %5, %c0_i32_1 : i32
    %7 = arith.extui %6 : i1 to i32
    %c0_i32_2 = arith.constant 0 : i32
    %8 = arith.cmpi ne, %7, %c0_i32_2 : i32
    scf.if %8 {
      %c0 = arith.constant 0 : index
      %c0_5 = arith.constant 0 : index
      %c0_6 = arith.constant 0 : index
      %12 = vector.load %arg5[%c0, %c0_5, %c0_6] : memref<1x8x512xi32, #tpu.memory_space<vmem>>, vector<1x8x512xi32>
      %13 = vector.shape_cast %12 : vector<1x8x512xi32> to vector<8x512xi32>
      %14 = vector.extract_strided_slice %13 {offsets = [0, 0], sizes = [1, 512], strides = [1, 1]} : vector<8x512xi32> to vector<1x512xi32>
      %15 = tpu.iota {dimensions = array<i32: 0>} : vector<128x512xi32>
      %16 = vector.broadcast %14 : vector<1x512xi32> to vector<128x512xi32>
      %17 = arith.cmpi eq, %15, %16 : vector<128x512xi32>
      %cst = arith.constant 1.000000e+00 : f32
      %cst_7 = arith.constant 0.000000e+00 : f32
      %18 = vector.broadcast %cst : f32 to vector<128x512xf32>
      %19 = vector.broadcast %cst_7 : f32 to vector<128x512xf32>
      %20 = arith.select %17, %18, %19 : vector<128x512xi1>, vector<128x512xf32>
      %21 = arith.truncf %20 : vector<128x512xf32> to vector<128x512xbf16>
      %c0_8 = arith.constant 0 : index
      %c0_9 = arith.constant 0 : index
      %22 = vector.load %arg12[%c0_8, %c0_9] : memref<128x32xf32, #tpu.memory_space<vmem>>, vector<128x32xf32>
      %c0_10 = arith.constant 0 : index
      %c0_11 = arith.constant 0 : index
      %c0_12 = arith.constant 0 : index
      %23 = vector.load %arg4[%c0_10, %c0_11, %c0_12] : memref<1x512x32xbf16, #tpu.memory_space<vmem>>, vector<1x512x32xbf16>
      %24 = vector.shape_cast %23 : vector<1x512x32xbf16> to vector<512x32xbf16>
      %cst_13 = arith.constant dense<0.000000e+00> : vector<128x32xf32>
      %25 = tpu.matmul %21, %24, %cst_13 {dimension_numbers = #tpu.dot_dimension_numbers<[1], [0], [0], [1], [0, 0, 1, 1], [], []>} : vector<128x512xbf16>, vector<512x32xbf16>, vector<128x32xf32> -> vector<128x32xf32>
      %26 = arith.addf %22, %25 : vector<128x32xf32>
      %c0_14 = arith.constant 0 : index
      %c0_15 = arith.constant 0 : index
      %27 = vector.load %arg12[%c0_14, %c0_15] : memref<128x32xf32, #tpu.memory_space<vmem>>, vector<128x32xf32>
      tpu.vector_store %arg12[%c0_14, %c0_15], %26 {strides = array<i32>} : memref<128x32xf32, #tpu.memory_space<vmem>>, vector<128x32xf32>,
    } else {
    }
    %c0_i32_3 = arith.constant 0 : i32
    %9 = arith.cmpi eq, %arg1, %c0_i32_3 : i32
    %10 = arith.extui %9 : i1 to i32
    %c0_i32_4 = arith.constant 0 : i32
    %11 = arith.cmpi ne, %10, %c0_i32_4 : i32
    scf.if %11 {
      %c0 = arith.constant 0 : index
      %c0_5 = arith.constant 0 : index
      %12 = vector.load %arg12[%c0, %c0_5] : memref<128x32xf32, #tpu.memory_space<vmem>>, vector<128x32xf32>
      %c0_6 = arith.constant 0 : index
      %c0_7 = arith.constant 0 : index
      %13 = vector.load %arg6[%c0_6, %c0_7] : memref<128x24xf32, #tpu.memory_space<vmem>>, vector<128x24xf32>
      %c0_8 = arith.constant 0 : index
      %c0_9 = arith.constant 0 : index
      %14 = vector.load %arg7[%c0_8, %c0_9] : memref<24x32xf32, #tpu.memory_space<vmem>>, vector<24x32xf32>
      %cst = arith.constant dense<0.000000e+00> : vector<128x32xf32>
      %15 = tpu.matmul %13, %14, %cst {dimension_numbers = #tpu.dot_dimension_numbers<[1], [0], [0], [1], [0, 0, 1, 1], [], []>} : vector<128x24xf32>, vector<24x32xf32>, vector<128x32xf32> -> vector<128x32xf32>
      %16 = arith.addf %12, %15 : vector<128x32xf32>
      %c0_10 = arith.constant 0 : index
      %c0_11 = arith.constant 0 : index
      %17 = vector.load %arg8[%c0_10, %c0_11] : memref<1x32xf32, #tpu.memory_space<vmem>>, vector<1x32xf32>
      %18 = vector.broadcast %17 : vector<1x32xf32> to vector<128x32xf32>
      %19 = arith.addf %16, %18 : vector<128x32xf32>
      %cst_12 = arith.constant 0.000000e+00 : f32
      %20 = vector.broadcast %cst_12 : f32 to vector<128x32xf32>
      %21 = arith.maximumf %19, %20 : vector<128x32xf32>
      %c0_13 = arith.constant 0 : index
      %c0_14 = arith.constant 0 : index
      %22 = vector.load %arg9[%c0_13, %c0_14] : memref<32x128xf32, #tpu.memory_space<vmem>>, vector<32x128xf32>
      %cst_15 = arith.constant dense<0.000000e+00> : vector<128x128xf32>
      %23 = tpu.matmul %21, %22, %cst_15 {dimension_numbers = #tpu.dot_dimension_numbers<[1], [0], [0], [1], [0, 0, 1, 1], [], []>} : vector<128x32xf32>, vector<32x128xf32>, vector<128x128xf32> -> vector<128x128xf32>
      %c0_16 = arith.constant 0 : index
      %c0_17 = arith.constant 0 : index
      %24 = vector.load %arg10[%c0_16, %c0_17] : memref<1x128xf32, #tpu.memory_space<vmem>>, vector<1x128xf32>
      %25 = vector.broadcast %24 : vector<1x128xf32> to vector<128x128xf32>
      %26 = arith.addf %23, %25 : vector<128x128xf32>
      %c0_18 = arith.constant 0 : index
      %c0_19 = arith.constant 0 : index
      %27 = vector.load %arg11[%c0_18, %c0_19] : memref<128x128xf32, #tpu.memory_space<vmem>>, vector<128x128xf32>
      tpu.vector_store %arg11[%c0_18, %c0_19], %26 {strides = array<i32>} : memref<128x128xf32, #tpu.memory_space<vmem>>, vector<128x128xf32>,
    } else {
    }
    return
  }
  func.func @transform_0(%arg0: i32, %arg1: i32, %arg2: memref<2x1xi32, #tpu.memory_space<smem>>, %arg3: memref<2x1xi32, #tpu.memory_space<smem>>) -> (i32, i32, i32) {
    %0 = arith.index_cast %arg0 : i32 to index
    %1 = arith.index_cast %arg1 : i32 to index
    %2 = memref.load %arg3[%0, %1] : memref<2x1xi32, #tpu.memory_space<smem>>
    %c0_i32 = arith.constant 0 : i32
    %c0_i32_0 = arith.constant 0 : i32
    return %arg0, %2, %c0_i32 : i32, i32, i32
  }
  func.func @transform_1(%arg0: i32, %arg1: i32, %arg2: memref<2x1xi32, #tpu.memory_space<smem>>, %arg3: memref<2x1xi32, #tpu.memory_space<smem>>) -> (i32, i32, i32) {
    %0 = arith.index_cast %arg0 : i32 to index
    %1 = arith.index_cast %arg1 : i32 to index
    %2 = memref.load %arg3[%0, %1] : memref<2x1xi32, #tpu.memory_space<smem>>
    %c0_i32 = arith.constant 0 : i32
    %c0_i32_0 = arith.constant 0 : i32
    return %arg0, %2, %c0_i32 : i32, i32, i32
  }
  func.func @transform_2(%arg0: i32, %arg1: i32, %arg2: memref<2x1xi32, #tpu.memory_space<smem>>, %arg3: memref<2x1xi32, #tpu.memory_space<smem>>) -> (i32, i32) {
    %c0_i32 = arith.constant 0 : i32
    %c0_i32_0 = arith.constant 0 : i32
    return %arg0, %c0_i32 : i32, i32
  }
  func.func @transform_3(%arg0: i32, %arg1: i32, %arg2: memref<2x1xi32, #tpu.memory_space<smem>>, %arg3: memref<2x1xi32, #tpu.memory_space<smem>>) -> (i32, i32) {
    %c0_i32 = arith.constant 0 : i32
    %c0_i32_0 = arith.constant 0 : i32
    %c0_i32_1 = arith.constant 0 : i32
    return %c0_i32, %c0_i32_0 : i32, i32
  }
  func.func @transform_4(%arg0: i32, %arg1: i32, %arg2: memref<2x1xi32, #tpu.memory_space<smem>>, %arg3: memref<2x1xi32, #tpu.memory_space<smem>>) -> (i32, i32) {
    %c0_i32 = arith.constant 0 : i32
    %c0_i32_0 = arith.constant 0 : i32
    %c0_i32_1 = arith.constant 0 : i32
    return %c0_i32, %c0_i32_0 : i32, i32
  }
  func.func @transform_5(%arg0: i32, %arg1: i32, %arg2: memref<2x1xi32, #tpu.memory_space<smem>>, %arg3: memref<2x1xi32, #tpu.memory_space<smem>>) -> (i32, i32) {
    %c0_i32 = arith.constant 0 : i32
    %c0_i32_0 = arith.constant 0 : i32
    %c0_i32_1 = arith.constant 0 : i32
    return %c0_i32, %c0_i32_0 : i32, i32
  }
  func.func @transform_6(%arg0: i32, %arg1: i32, %arg2: memref<2x1xi32, #tpu.memory_space<smem>>, %arg3: memref<2x1xi32, #tpu.memory_space<smem>>) -> (i32, i32) {
    %c0_i32 = arith.constant 0 : i32
    %c0_i32_0 = arith.constant 0 : i32
    %c0_i32_1 = arith.constant 0 : i32
    return %c0_i32, %c0_i32_0 : i32, i32
  }
  func.func @transform_7(%arg0: i32, %arg1: i32, %arg2: memref<2x1xi32, #tpu.memory_space<smem>>, %arg3: memref<2x1xi32, #tpu.memory_space<smem>>) -> (i32, i32) {
    %c0_i32 = arith.constant 0 : i32
    %c0_i32_0 = arith.constant 0 : i32
    return %arg0, %c0_i32 : i32, i32
  }
}

</mosaic_0001>

<bundles_post_ra>
// kernel: tpu_custom_call.1
= control target key start
LH: loop header
LB: loop body
LE: loop exit
PB: predicated region body
PF: predicated region fallthrough
CT: control target
= control target key end

     0   :  { %s2935_s0 = inlined_call_operand.vmem [shape: s32[2,1], index: 0, kind: input, shape index: {}]   ;;  %s2936_s2 = inlined_call_operand.vmem [shape: bf16[2,512,32], index: 2, kind: input, shape index: {}]   ;;  %s2937_s3 = inlined_call_operand.vmem [shape: s32[2,8,512], index: 3, kind: input, shape index: {}]   ;;  %s2938_s4 = inlined_call_operand.vmem [shape: f32[256,24], index: 4, kind: input, shape index: {}]   ;;  %s2939_s5 = inlined_call_operand.vmem [shape: f32[24,32], index: 5, kind: input, shape index: {}]   ;;  %s2940_s6 = inlined_call_operand.vmem [shape: f32[1,32], index: 6, kind: input, shape index: {}]   ;;  %s2941_s7 = inlined_call_operand.vmem [shape: f32[32,128], index: 7, kind: input, shape index: {}]   ;;  %s2942_s8 = inlined_call_operand.vmem [shape: f32[1,128], index: 8, kind: input, shape index: {}]   ;;  %s2943_s9 = inlined_call_operand.hbm [shape: f32[256,128], index: 9, kind: output, shape index: {}]   ;;  %s2944_s1 = inlined_call_operand.vmem [shape: s32[2,1], index: 1, kind: input, shape index: {}]  }
   0x1   :  { %2955 = sst [smem:[#allocation17_spill]] %s2943_s9  ;;  %s14_s11 = sshll.u32 %s2935_s0, 4  ;;  %s15_s11 = int_to_ptr.vmem [resolvable:$true] %s14_s11 }
   0x2   :  { %s18_s14 = sshll.u32 %s2944_s1, 4  ;;  %s2327_s15 = scalar_lea.vmem %s15_s11, 32  ;;  %s19_s14 = int_to_ptr.vmem [resolvable:$true] %s18_s14 }
   0x3   :  { %p2328_p0 = scmp.ne.s32.totalorder %s15_s11, %s2327_s15  ;;  %p2332_p1 = scmp.lt.s32.totalorder %s15_s11, %s15_s11 }
   0x4   :  { %p2333_p2 = scmp.lt.s32.totalorder %s2327_s15, %s2327_s15 }
   0x6   :  { %p2334_p3 = por %p2333_p2, %p2332_p1 }
   0x8   :  { %p2335_p4 = pnand %p2334_p3, %p2328_p0 }
   0xa   :  { %2338 = shalt.err (!%p2335_p4)  }
   0xb   :  { %s2431_s16 = smov [#allocation4]   ;;  %s2339_s17 = scalar_lea.vmem %s19_s14, 32 }
   0xc   :  { %17 = dma.vmem_to_smem %s15_s11, 32, %s2431_s16, [#allocation3] }
   0xd   :  { %p2340_p5 = scmp.ne.s32.totalorder %s19_s14, %s2339_s17  ;;  %p2344_p6 = scmp.lt.s32.totalorder %s19_s14, %s19_s14 }
   0xe   :  { %p2345_p7 = scmp.lt.s32.totalorder %s2339_s17, %s2339_s17 }
  0x10   :  { %p2346_p8 = por %p2345_p7, %p2344_p6 }
  0x12   :  { %p2347_p9 = pnand %p2346_p8, %p2340_p5 }
  0x14   :  { %2350 = shalt.err (!%p2347_p9)  }
  0x15   :  { %s2432_s0 = smov [#allocation5]  }
  0x16   :  { %21 = dma.vmem_to_smem %s19_s14, 32, %s2432_s0, [#allocation3] }
  0x17   :  { %2401 = dma.done.wait [#allocation3], 64 }
  0x18   :  { %2402 = vsyncadd [#allocation3], 4294967232 }
  0x19   :  { %23 = sfence }
  0x1a   :  { %24 = vsyncpa [#allocation7], 0 }
  0x1b   :  { %26 = vsyncpa [#allocation7 + $0x1], 0  ;;  %s2494_s1 = smov 0   ;;  %s2496_s18 = smov 0  }
  0x1c   :  { %s2498_s19 = smov 0   ;;  %s2500_s20 = smov 0  }
  0x1d   :  { %s2502_s21 = smov 0   ;;  %s2504_s22 = smov 0  }
  0x1e LB: > { %2956 = sst [smem:[#allocation10_spill]] %s2409_s1  ;;  %s1847_s23 = sadd.s32 4294967295, %s2429_s22   ;;  %s2429_s22 = sphi %s2504_s22, %s32_s22   ;;  %s2425_s21 = sphi %s2502_s21, %s3006_s21   ;;  %s2421_s20 = sphi %s2500_s20, %s3005_s20   ;;  %s2417_s19 = sphi %s2498_s19, %s3004_s19   ;;  %s2413_s18 = sphi %s2496_s18, %s3008_s18   ;;  %s2409_s1 = sphi %s2494_s1, %s3007_s1  }
  0x1f   : > { %2957 = sst [smem:[#allocation11_spill]] %s2417_s19  ;;  %s1848_s24 = sadd.s32 4294967294, %s2429_s22  }
  0x20   : > { %2958 = sst [smem:[#allocation12_spill]] %s2425_s21  ;;  %s44_s25 = sadd.s32 1, %s2425_s21 }
  0x21   : > { %2959 = sst [smem:[#allocation13_spill]] %s2429_s22  ;;  %s249_s26 = sadd.s32 1, %s2417_s19 }
  0x22   : > { %p46_p10 = scmp.ge.s32.totalorder %s44_s25, 2  ;;  %p259_p11 = scmp.ne.s32.totalorder %s2417_s19, %s2413_s18 }
  0x23   : > { %p260_p12 = scmp.eq.s32.totalorder %s1847_s23, 1  ;;  %p265_p13 = scmp.ne.s32.totalorder %s2413_s18, %s2409_s1 }
  0x24   : > { %s3010_s25 = smov (%p46_p10, %s44_s25), 0  ;;  %p266_p1 = scmp.eq.s32.totalorder %s1848_s24, 1 }
  0x25   : > { %2960 = sst [smem:[#allocation14_spill]] %s3010_s25  ;;  %p2534_p0 = por %p260_p12, %p259_p11 }
  0x26   : > { %s246_s28 = ssub.s32 %s2425_s21, %s3010_s25  ;;  %p1855_p2 = scmp.ge.s32.totalorder %s2429_s22, 1 }
  0x27   : > { %p247_p3 = scmp.eq.s32.totalorder %s246_s28, 0  ;;  %p2541_p4 = por %p266_p1, %p265_p13 }
  0x28   : > { %p362_p5 = scmp.lt.s32.totalorder %s2429_s22, 3 }
  0x29   : > { %s2962_s29 = scalar_select %p2541_p4, 1, 0 }
  0x2a   : > { %s2547_s30 = scalar_select %p247_p3, %s2417_s19, %s249_s26  }
  0x2b   : > { %2963 = sst [smem:[#allocation15_spill]] %s2962_s29  ;;  %p363_p6 = pnand %p1855_p2, %p362_p5 }
  0x2c   : > { %2964 = sst [smem:[#allocation16_spill]] %s2547_s30  ;;  %s2945_s10 = sand.u32 (!%p363_p6), 1, %s2413_s18  }
  0x2d   : > { %366 = sbr.rel (%p363_p6) target bundleno = 812 (0x32c), region = 48  ;;  %s1857_s11 = sshll.u32 (!%p363_p6), %s2421_s20, 7 }
  0x2e   : > { %s2553_s12 = sshll.u32 (!%p363_p6), %s2945_s10, 7  ;;  %s435_s13 = sld [smem:[#allocation5 + %s1857_s11]] (!%p363_p6) }
  0x2f   : > { %p437_p7 = scmp.lt.s32.totalorder (!%p363_p6), %s2421_s20, 1  ;;  %s461_s14 = sld [smem:[#allocation5 + %s1857_s11]] (!%p363_p6) }
  0x30   : > { %s515_s16 = sld [smem:[#allocation4 + %s1857_s11]] (!%p363_p6)  ;;  %s1865_s0 = sshll.u32 (!%p363_p6), %s2421_s20, 4 }
  0x31   : > { %p480_p10 = scmp.lt.s32.totalorder (!%p363_p6), %s1865_s0, 31 }
  0x32   : > { %vm2954_vm0 = vcmask 261120   ;;  %v2433_v0 = vmov 0.0   ;;  %s438_s15 = scalar_select %p437_p7, %s2421_s20, 1 }
  0x33   : > { %492 = vst.msk [vmem:[#allocation2] sm:$0xff] %vm2954_vm0, %v2433_v0  ;;  %493 = vst.msk [vmem:[#allocation2 + $0x8] sm:$0xff] %vm2954_vm0, %v2433_v0  ;;  %s3016_s0 = smov (!%p480_p10, %s1865_s0), 31 }
  0x34   : > { %494 = vst.msk [vmem:[#allocation2 + $0x10] sm:$0xff] %vm2954_vm0, %v2433_v0  ;;  %495 = vst.msk [vmem:[#allocation2 + $0x18] sm:$0xff] %vm2954_vm0, %v2433_v0  ;;  %s1858_s17 = sshll.u32 %s435_s13, 6  ;;  %s1859_s23 = sshll.u32 %s438_s15, 6 }
  0x35   : > { %496 = vst.msk [vmem:[#allocation2 + $0x20] sm:$0xff] %vm2954_vm0, %v2433_v0  ;;  %497 = vst.msk [vmem:[#allocation2 + $0x28] sm:$0xff] %vm2954_vm0, %v2433_v0  ;;  %p439_p8 = scmp.lt.s32.totalorder %s1858_s17, 63  ;;  %p464_p9 = scmp.lt.s32.totalorder %s461_s14, 0 }
  0x36   : > { %498 = vst.msk [vmem:[#allocation2 + $0x30] sm:$0xff] %vm2954_vm0, %v2433_v0  ;;  %499 = vst.msk [vmem:[#allocation2 + $0x38] sm:$0xff] %vm2954_vm0, %v2433_v0  ;;  %s1863_s24 = sshll.u32 %s438_s15, 2  ;;  %s1866_s15 = sshll.u32 %s3016_s0, 3 }
  0x37   : > { %500 = vst.msk [vmem:[#allocation2 + $0x40] sm:$0xff] %vm2954_vm0, %v2433_v0  ;;  %501 = vst.msk [vmem:[#allocation2 + $0x48] sm:$0xff] %vm2954_vm0, %v2433_v0  ;;  %s3012_s17 = smov (!%p439_p8, %s1858_s17), 63  ;;  %s3014_s14 = smov (!%p464_p9, %s461_s14), 0 }
  0x38   : > { %502 = vst.msk [vmem:[#allocation2 + $0x50] sm:$0xff] %vm2954_vm0, %v2433_v0  ;;  %503 = vst.msk [vmem:[#allocation2 + $0x58] sm:$0xff] %vm2954_vm0, %v2433_v0  ;;  %s442_s26 = sadd.s32 %s1859_s23, %s3012_s17  ;;  %s1862_s10 = sshll.u32 %s3014_s14, 2 }
  0x39   : > { %504 = vst.msk [vmem:[#allocation2 + $0x60] sm:$0xff] %vm2954_vm0, %v2433_v0  ;;  %505 = vst.msk [vmem:[#allocation2 + $0x68] sm:$0xff] %vm2954_vm0, %v2433_v0  ;;  %s1860_s28 = sshll.u32 %s442_s26, 2  ;;  %s468_s19 = sadd.s32 %s1863_s24, %s1862_s10 }
  0x3a   : > { %506 = vst.msk [vmem:[#allocation2 + $0x70] sm:$0xff] %vm2954_vm0, %v2433_v0  ;;  %507 = vst.msk [vmem:[#allocation2 + $0x78] sm:$0xff] %vm2954_vm0, %v2433_v0  ;;  %s2577_s30 = scalar_lea.vmem %s2936_s2, %s1860_s28  ;;  %s1864_s11 = sshll.u32 %s468_s19, 3 }
  0x3b   : > { %s2582_s1 = scalar_lea.vmem %s2937_s3, %s1864_s11  ;;  %s2587_s17 = scalar_lea.vmem %s2938_s4, %s1866_s15 }
  0x3c   : > { %s2590_s14 = scalar_lea.vmem [#allocation6], %s2553_s12  ;;  %p1868_p11 = scmp.le.s32.totalorder %s515_s16, 0 }
  0x3e   : > { %519 = sbr.rel (%p1868_p11) target bundleno = 364 (0x16c), region = 56 }
  0x43   : > { %v2295_v1 = vld [vmem:[%s2577_s30 + $0x78] sm:$0xff]   ;;  %v2299_v5 = vld [vmem:[%s2577_s30 + $0x70] sm:$0xff]   ;;  %v2303_v9 = vld [vmem:[%s2577_s30 + $0x68] sm:$0xff]   ;;  %v524_v23 = vlaneseq  ;;  %v2434_v47 = vmov 1.0|1.0  }
  0x44   : > { %v2296_v2 = vld [vmem:[%s2577_s30 + $0xf8] sm:$0xff]   ;;  %2005 = vmatprep.subr.bf16.mxu0 %v2295_v1  ;;  %v2300_v6 = vld [vmem:[%s2577_s30 + $0xf0] sm:$0xff]   ;;  %v2304_v10 = vld [vmem:[%s2577_s30 + $0xe8] sm:$0xff]  }
  0x45   : > { %v2297_v3 = vld [vmem:[%s2577_s30 + $0x38] sm:$0xff]   ;;  %2069 = vmatprep.subr.bf16.mxu1 %v2296_v2  ;;  %v2301_v7 = vld [vmem:[%s2577_s30 + $0x30] sm:$0xff]   ;;  %v2305_v11 = vld [vmem:[%s2577_s30 + $0x28] sm:$0xff]   ;;  %v2618_v28 = vshrl.u32 %v524_v23, 7 }
  0x46   : > { %v2298_v4 = vld [vmem:[%s2577_s30 + $0xb8] sm:$0xff]   ;;  %2006 = vmatpush3.bf16.msra.mxu0 %v2297_v3  ;;  %v2302_v8 = vld [vmem:[%s2577_s30 + $0xb0] sm:$0xff]   ;;  %v2306_v12 = vld [vmem:[%s2577_s30 + $0xa8] sm:$0xff]  }
  0x47   : > { %2070 = vmatpush3.bf16.msra.mxu1 %v2298_v4  ;;  %2007 = vmatprep.subr.bf16.mxu0 %v2299_v5  ;;  %v2307_v13 = vld [vmem:[%s2577_s30 + $0x60] sm:$0xff]   ;;  %v2311_v17 = vld [vmem:[%s2577_s30 + $0x58] sm:$0xff]   ;;  %v2315_v21 = vld [vmem:[%s2577_s30 + $0x50] sm:$0xff]   ;;  %v543_v33 = vsub.s32 0, %v2618_v28  ;;  %v526_v36 = vadd.s32 8, %v2618_v28  ;;  %v527_v40 = vadd.s32 16, %v2618_v28 }
  0x48   : > { %2071 = vmatprep.subr.bf16.mxu1 %v2300_v6  ;;  %v2308_v14 = vld [vmem:[%s2577_s30 + $0xe0] sm:$0xff]   ;;  %v2312_v18 = vld [vmem:[%s2577_s30 + $0xd8] sm:$0xff]   ;;  %v2316_v22 = vld [vmem:[%s2577_s30 + $0xd0] sm:$0xff]   ;;  %v528_v45 = vadd.s32 24, %v2618_v28  ;;  %v529_v48 = vadd.s32 32, %v2618_v28  ;;  %v530_v49 = vadd.s32 40, %v2618_v28 }
  0x49   : > { %v2309_v15 = vld [vmem:[%s2577_s30 + $0x20] sm:$0xff]   ;;  %v2313_v19 = vld [vmem:[%s2577_s30 + $0x18] sm:$0xff]   ;;  %v2317_v24 = vld [vmem:[%s2577_s30 + $0x10] sm:$0xff]   ;;  %v531_v50 = vadd.s32 48, %v2618_v28  ;;  %v532_v51 = vadd.s32 56, %v2618_v28  ;;  %v533_v52 = vadd.s32 64, %v2618_v28 }
  0x4a   : > { %2008 = vmatpush3.bf16.msra.mxu0 %v2301_v7  ;;  %v2310_v16 = vld [vmem:[%s2577_s30 + $0xa0] sm:$0xff]   ;;  %v2314_v20 = vld [vmem:[%s2577_s30 + $0x98] sm:$0xff]   ;;  %v2318_v25 = vld [vmem:[%s2577_s30 + $0x90] sm:$0xff]   ;;  %v534_v53 = vadd.s32 72, %v2618_v28  ;;  %v535_v54 = vadd.s32 80, %v2618_v28  ;;  %v536_v55 = vadd.s32 88, %v2618_v28 }
  0x4b   : > { %2072 = vmatpush3.bf16.msra.mxu1 %v2302_v8  ;;  %2009 = vmatprep.subr.bf16.mxu0 %v2303_v9  ;;  %v2319_v26 = vld [vmem:[%s2577_s30 + $0x48] sm:$0xff]   ;;  %v2323_v31 = vld [vmem:[%s2577_s30 + $0x40] sm:$0xff]   ;;  %v523_v38 = vld [vmem:[%s2582_s1 + $0x18] sm:$0xff]  ;;  %v537_v56 = vadd.s32 96, %v2618_v28  ;;  %v538_v57 = vadd.s32 104, %v2618_v28  ;;  %v539_v58 = vadd.s32 112, %v2618_v28 }
  0x4c   : > { %2073 = vmatprep.subr.bf16.mxu1 %v2304_v10  ;;  %v2320_v27 = vld [vmem:[%s2577_s30 + $0xc8] sm:$0xff]   ;;  %v2324_v32 = vld [vmem:[%s2577_s30 + $0xc0] sm:$0xff]   ;;  %v2634_v42 = vrot.slane %v523_v38, %v543_v33  ;;  %v522_v44 = vld [vmem:[%s2582_s1 + $0x10] sm:$0xff]  ;;  %v540_v59 = vadd.s32 120, %v2618_v28 }
  0x4d   : > { %v2321_v29 = vld [vmem:[%s2577_s30 + $0x8] sm:$0xff]   ;;  %v2325_v34 = vld [vmem:[%s2577_s30] sm:$0xff]   ;;  %v2640_v46 = vrot.slane %v522_v44, %v543_v33 }
  0x4e   : > { %2010 = vmatpush3.bf16.msra.mxu0 %v2305_v11  ;;  %v2322_v30 = vld [vmem:[%s2577_s30 + $0x88] sm:$0xff]   ;;  %v2326_v35 = vld [vmem:[%s2577_s30 + $0x80] sm:$0xff]   ;;  %vm560_vm3 = vcmp.eq.s32.totalorder %v2618_v28, %v2634_v42  ;;  %vm564_vm4 = vcmp.eq.s32.totalorder %v526_v36, %v2634_v42  ;;  %vm568_vm14 = vcmp.eq.s32.totalorder %v527_v40, %v2634_v42  ;;  %vm572_vm15 = vcmp.eq.s32.totalorder %v528_v45, %v2634_v42 }
  0x4f   : > { %2074 = vmatpush3.bf16.msra.mxu1 %v2306_v12  ;;  %2011 = vmatprep.subr.bf16.mxu0 %v2307_v13  ;;  %v521_v37 = vld [vmem:[%s2582_s1 + $0x8] sm:$0xff]  ;;  %v520_v39 = vld [vmem:[%s2582_s1] sm:$0xff]  ;;  %vm559_vm8 = vcmp.eq.s32.totalorder %v2618_v28, %v2640_v46  ;;  %vm563_vm9 = vcmp.eq.s32.totalorder %v526_v36, %v2640_v46  ;;  %vm1933_vm10 = vmpackc.low %vm564_vm4, %vm560_vm3 }
  0x50   : > { %2075 = vmatprep.subr.bf16.mxu1 %v2308_v14  ;;  %v2632_v41 = vrot.slane %v521_v37, %v543_v33  ;;  %v2636_v43 = vrot.slane %v520_v39, %v543_v33  ;;  %1934 = vmatprep.mubr.msk.bf16.mxu1 %vm1933_vm10, %v2434_v47  ;;  %v717_v3 = vld [vmem:[#allocation2] sm:$0xff]  ;;  %v718_v12 = vld [vmem:[#allocation2 + $0x8] sm:$0xff] }
  0x51   : > { %v721_v39 = vld [vmem:[#allocation2 + $0x20] sm:$0xff] }
  0x52   : > { %2012 = vmatpush3.bf16.msra.mxu0 %v2309_v15  ;;  %vm558_vm1 = vcmp.eq.s32.totalorder %v2618_v28, %v2632_v41  ;;  %vm562_vm2 = vcmp.eq.s32.totalorder %v526_v36, %v2632_v41  ;;  %vm557_vm6 = vcmp.eq.s32.totalorder %v2618_v28, %v2636_v43  ;;  %vm561_vm7 = vcmp.eq.s32.totalorder %v526_v36, %v2636_v43 }
  0x53   : > { %2076 = vmatpush3.bf16.msra.mxu1 %v2310_v16  ;;  %2013 = vmatprep.subr.bf16.mxu0 %v2311_v17  ;;  %vm1901_vm5 = vmpackc.low %vm562_vm2, %vm558_vm1  ;;  %vm566_vm11 = vcmp.eq.s32.totalorder %v527_v40, %v2632_v41  ;;  %vm570_vm12 = vcmp.eq.s32.totalorder %v528_v45, %v2632_v41  ;;  %vm565_vm3 = vcmp.eq.s32.totalorder %v527_v40, %v2636_v43 }
  0x54   : > { %2077 = vmatprep.subr.bf16.mxu1 %v2312_v18  ;;  %1902 = vmatprep.mubr.msk.bf16.mxu0 %vm1901_vm5, %v2434_v47  ;;  %vm1903_vm13 = vmpackc.low %vm561_vm7, %vm557_vm6  ;;  %vm569_vm4 = vcmp.eq.s32.totalorder %v528_v45, %v2636_v43  ;;  %vm567_vm6 = vcmp.eq.s32.totalorder %v527_v40, %v2640_v46  ;;  %vm571_vm7 = vcmp.eq.s32.totalorder %v528_v45, %v2640_v46 }
  0x55   : > { %vm1935_vm1 = vmpackc.low %vm563_vm9, %vm559_vm8  ;;  %vm574_vm10 = vcmp.eq.s32.totalorder %v529_v48, %v2632_v41  ;;  %vm578_vm8 = vcmp.eq.s32.totalorder %v530_v49, %v2632_v41 }
  0x56   : > { %2014 = vmatpush3.bf16.msra.mxu0 %v2313_v19  ;;  %vm1905_vm2 = vmpackc.low %vm570_vm12, %vm566_vm11  ;;  %vm576_vm11 = vcmp.eq.s32.totalorder %v529_v48, %v2634_v42  ;;  %vm580_vm12 = vcmp.eq.s32.totalorder %v530_v49, %v2634_v42 }
  0x57   : > { %2078 = vmatpush3.bf16.msra.mxu1 %v2314_v20  ;;  %2015 = vmatprep.subr.bf16.mxu0 %v2315_v21  ;;  %vm1937_vm5 = vmpackc.low %vm572_vm15, %vm568_vm14  ;;  %vm573_vm14 = vcmp.eq.s32.totalorder %v529_v48, %v2636_v43  ;;  %vm577_vm15 = vcmp.eq.s32.totalorder %v530_v49, %v2636_v43  ;;  %v719_v21 = vld [vmem:[#allocation2 + $0x10] sm:$0xff] }
  0x58   : > { %2079 = vmatprep.subr.bf16.mxu1 %v2316_v22  ;;  %vm1907_vm9 = vmpackc.low %vm569_vm4, %vm565_vm3  ;;  %vm579_vm3 = vcmp.eq.s32.totalorder %v530_v49, %v2640_v46  ;;  %vm582_vm4 = vcmp.eq.s32.totalorder %v531_v50, %v2632_v41 }
  0x59   : > { %vm1941_vm0 = vmpackc.low %vm580_vm12, %vm576_vm11  ;;  %vm585_vm12 = vcmp.eq.s32.totalorder %v532_v51, %v2636_v43 }
  0x5a   : > { %2016 = vmatpush3.bf16.msra.mxu0 %v2317_v24 }
  0x5b   : > { %2080 = vmatpush3.bf16.msra.mxu1 %v2318_v25  ;;  %2017 = vmatprep.subr.bf16.mxu0 %v2319_v26 }
  0x5c   : > { %2081 = vmatprep.subr.bf16.mxu1 %v2320_v27 }
  0x5e   : > { %2018 = vmatpush3.bf16.msra.mxu0 %v2321_v29 }
  0x5f   : > { %2082 = vmatpush3.bf16.msra.mxu1 %v2322_v30  ;;  %2019 = vmatprep.subr.bf16.mxu0 %v2323_v31  ;;  %v720_v30 = vld [vmem:[#allocation2 + $0x18] sm:$0xff] }
  0x60   : > { %2083 = vmatprep.subr.bf16.mxu1 %v2324_v32 }
  0x62   : > { %2020 = vmatpush3.bf16.msra.mxu0 %v2325_v34 }
  0x63   : > { %2084 = vmatpush3.bf16.msra.mxu1 %v2326_v35 }
  0x65   : > { %1904 = vmatmul.mubr.msk.bf16.vlgmr.msra.gmra.mxu0 %vm1903_vm13, %v2434_v47  ;;  %vm1939_vm13 = vmpackc.low %vm571_vm7, %vm567_vm6  ;;  %vm584_vm7 = vcmp.eq.s32.totalorder %v531_v50, %v2634_v42 }
  0x66   : > { %1936 = vmatmul.mubr.msk.bf16.vlgmr.msra.gmra.mxu1 %vm1935_vm1, %v2434_v47  ;;  %1906 = vmatprep.mubr.msk.bf16.mxu0 %vm1905_vm2, %v2434_v47  ;;  %vm1909_vm1 = vmpackc.low %vm578_vm8, %vm574_vm10  ;;  %vm575_vm2 = vcmp.eq.s32.totalorder %v529_v48, %v2640_v46  ;;  %vm588_vm10 = vcmp.eq.s32.totalorder %v532_v51, %v2634_v42  ;;  %v722_v48 = vld [vmem:[#allocation2 + $0x28] sm:$0xff] }
  0x67   : > { %1938 = vmatprep.mubr.msk.bf16.mxu1 %vm1937_vm5, %v2434_v47  ;;  %vm586_vm5 = vcmp.eq.s32.totalorder %v532_v51, %v2632_v41  ;;  %vm1911_vm6 = vmpackc.low %vm577_vm15, %vm573_vm14  ;;  %vm590_vm14 = vcmp.eq.s32.totalorder %v533_v52, %v2632_v41  ;;  %vm594_vm15 = vcmp.eq.s32.totalorder %v534_v53, %v2632_v41 }
  0x68   : > { %vm1943_vm8 = vmpackc.low %vm579_vm3, %vm575_vm2  ;;  %vm592_vm3 = vcmp.eq.s32.totalorder %v533_v52, %v2634_v42 }
  0x69   : > { %vm1945_vm11 = vmpackc.low %vm588_vm10, %vm584_vm7  ;;  %vm589_vm10 = vcmp.eq.s32.totalorder %v533_v52, %v2636_v43 }
  0x6d   : > { %1908 = vmatmul.mubr.msk.bf16.gmra.mxu0 %vm1907_vm9, %v2434_v47  ;;  %vm1913_vm9 = vmpackc.low %vm586_vm5, %vm582_vm4  ;;  %vm596_vm4 = vcmp.eq.s32.totalorder %v534_v53, %v2634_v42 }
  0x6e   : > { %1940 = vmatmul.mubr.msk.bf16.gmra.mxu1 %vm1939_vm13, %v2434_v47  ;;  %1910 = vmatprep.mubr.msk.bf16.mxu0 %vm1909_vm1, %v2434_v47  ;;  %vm583_vm13 = vcmp.eq.s32.totalorder %v531_v50, %v2640_v46  ;;  %vm587_vm1 = vcmp.eq.s32.totalorder %v532_v51, %v2640_v46  ;;  %vm1949_vm7 = vmpackc.low %vm596_vm4, %vm592_vm3  ;;  %vm597_vm4 = vcmp.eq.s32.totalorder %v535_v54, %v2636_v43 }
  0x6f   : > { %1942 = vmatprep.mubr.msk.bf16.mxu1 %vm1941_vm0, %v2434_v47  ;;  %vm581_vm0 = vcmp.eq.s32.totalorder %v531_v50, %v2636_v43  ;;  %vm1947_vm5 = vmpackc.low %vm587_vm1, %vm583_vm13  ;;  %vm600_vm1 = vcmp.eq.s32.totalorder %v535_v54, %v2634_v42 }
  0x70   : > { %vm1915_vm2 = vmpackc.low %vm585_vm12, %vm581_vm0  ;;  %vm598_vm0 = vcmp.eq.s32.totalorder %v535_v54, %v2632_v41  ;;  %vm602_vm12 = vcmp.eq.s32.totalorder %v536_v55, %v2632_v41 }
  0x75   : > { %1912 = vmatmul.mubr.msk.bf16.gmra.mxu0 %vm1911_vm6, %v2434_v47  ;;  %vm1917_vm6 = vmpackc.low %vm594_vm15, %vm590_vm14  ;;  %vm604_vm14 = vcmp.eq.s32.totalorder %v536_v55, %v2634_v42 }
  0x76   : > { %1944 = vmatmul.mubr.msk.bf16.gmra.mxu1 %vm1943_vm8, %v2434_v47  ;;  %1914 = vmatprep.mubr.msk.bf16.mxu0 %vm1913_vm9, %v2434_v47  ;;  %vm593_vm8 = vcmp.eq.s32.totalorder %v534_v53, %v2636_v43  ;;  %vm591_vm9 = vcmp.eq.s32.totalorder %v533_v52, %v2640_v46  ;;  %vm1953_vm3 = vmpackc.low %vm604_vm14, %vm600_vm1  ;;  %vm605_vm14 = vcmp.eq.s32.totalorder %v537_v56, %v2636_v43 }
  0x77   : > { %1946 = vmatprep.mubr.msk.bf16.mxu1 %vm1945_vm11, %v2434_v47  ;;  %vm595_vm11 = vcmp.eq.s32.totalorder %v534_v53, %v2640_v46  ;;  %vm1919_vm13 = vmpackc.low %vm593_vm8, %vm589_vm10  ;;  %vm606_vm10 = vcmp.eq.s32.totalorder %v537_v56, %v2632_v41  ;;  %vm610_vm8 = vcmp.eq.s32.totalorder %v538_v57, %v2632_v41 }
  0x78   : > { %vm1951_vm15 = vmpackc.low %vm595_vm11, %vm591_vm9  ;;  %vm608_vm11 = vcmp.eq.s32.totalorder %v537_v56, %v2634_v42 }
  0x7d   : > { %1916 = vmatmul.mubr.msk.bf16.gmra.mxu0 %vm1915_vm2, %v2434_v47  ;;  %vm1921_vm2 = vmpackc.low %vm602_vm12, %vm598_vm0  ;;  %vm612_vm0 = vcmp.eq.s32.totalorder %v538_v57, %v2634_v42 }
  0x7e   : > { %1948 = vmatmul.mubr.msk.bf16.gmra.mxu1 %vm1947_vm5, %v2434_v47  ;;  %1918 = vmatprep.mubr.msk.bf16.mxu0 %vm1917_vm6, %v2434_v47  ;;  %vm601_vm5 = vcmp.eq.s32.totalorder %v536_v55, %v2636_v43  ;;  %vm599_vm6 = vcmp.eq.s32.totalorder %v535_v54, %v2640_v46  ;;  %vm1957_vm1 = vmpackc.low %vm612_vm0, %vm608_vm11  ;;  %vm613_vm0 = vcmp.eq.s32.totalorder %v539_v58, %v2636_v43 }
  0x7f   : > { %1950 = vmatprep.mubr.msk.bf16.mxu1 %vm1949_vm7, %v2434_v47  ;;  %vm603_vm7 = vcmp.eq.s32.totalorder %v536_v55, %v2640_v46  ;;  %vm1923_vm9 = vmpackc.low %vm601_vm5, %vm597_vm4  ;;  %vm614_vm4 = vcmp.eq.s32.totalorder %v539_v58, %v2632_v41  ;;  %vm618_vm5 = vcmp.eq.s32.totalorder %v540_v59, %v2632_v41 }
  0x80   : > { %vm1955_vm12 = vmpackc.low %vm603_vm7, %vm599_vm6  ;;  %vm616_vm7 = vcmp.eq.s32.totalorder %v539_v58, %v2634_v42 }
  0x85   : > { %1920 = vmatmul.mubr.msk.bf16.gmra.mxu0 %vm1919_vm13, %v2434_v47  ;;  %vm1925_vm13 = vmpackc.low %vm610_vm8, %vm606_vm10  ;;  %vm620_vm10 = vcmp.eq.s32.totalorder %v540_v59, %v2634_v42 }
  0x86   : > { %1952 = vmatmul.mubr.msk.bf16.gmra.mxu1 %vm1951_vm15, %v2434_v47  ;;  %1922 = vmatprep.mubr.msk.bf16.mxu0 %vm1921_vm2, %v2434_v47  ;;  %vm609_vm15 = vcmp.eq.s32.totalorder %v538_v57, %v2636_v43  ;;  %vm607_vm2 = vcmp.eq.s32.totalorder %v537_v56, %v2640_v46  ;;  %vm1961_vm11 = vmpackc.low %vm620_vm10, %vm616_vm7 }
  0x87   : > { %1954 = vmatprep.mubr.msk.bf16.mxu1 %vm1953_vm3, %v2434_v47  ;;  %vm611_vm3 = vcmp.eq.s32.totalorder %v538_v57, %v2640_v46  ;;  %vm1927_vm6 = vmpackc.low %vm609_vm15, %vm605_vm14  ;;  %v723_v57 = vld [vmem:[#allocation2 + $0x30] sm:$0xff] }
  0x88   : > { %vm1959_vm8 = vmpackc.low %vm611_vm3, %vm607_vm2  ;;  %vm2965_vm2 = vcmask 261120  }
  0x89   : > { %vm2966_vm3 = vmmov %vm2965_vm2 }
  0x8a   : > { %vm2970_vm7 = vmmov %vm2965_vm2 }
  0x8b   : > { %vm2971_vm10 = vmmov %vm2965_vm2 }
  0x8d   : > { %1924 = vmatmul.mubr.msk.bf16.gmra.mxu0 %vm1923_vm9, %v2434_v47  ;;  %vm1929_vm9 = vmpackc.low %vm618_vm5, %vm614_vm4 }
  0x8e   : > { %1956 = vmatmul.mubr.msk.bf16.gmra.mxu1 %vm1955_vm12, %v2434_v47  ;;  %1926 = vmatprep.mubr.msk.bf16.mxu0 %vm1925_vm13, %v2434_v47  ;;  %vm617_vm12 = vcmp.eq.s32.totalorder %v540_v59, %v2636_v43  ;;  %vm615_vm13 = vcmp.eq.s32.totalorder %v539_v58, %v2640_v46  ;;  %vm2967_vm4 = vmmov %vm2965_vm2 }
  0x8f   : > { %1958 = vmatprep.mubr.msk.bf16.mxu1 %vm1957_vm1, %v2434_v47  ;;  %vm619_vm1 = vcmp.eq.s32.totalorder %v540_v59, %v2640_v46  ;;  %vm1931_vm14 = vmpackc.low %vm617_vm12, %vm613_vm0 }
  0x90   : > { %vm1963_vm15 = vmpackc.low %vm619_vm1, %vm615_vm13 }
  0x91   : > { %vm2968_vm5 = vmmov %vm2965_vm2 }
  0x92   : > { %vm2975_vm0 = vmmov %vm2965_vm2 }
  0x93   : > { %vm2976_vm12 = vmmov %vm2975_vm0 }
  0x94   : > { %vm2977_vm13 = vmmov %vm2975_vm0 }
  0x95   : > { %1928 = vmatmul.mubr.msk.bf16.gmra.mxu0 %vm1927_vm6, %v2434_v47  ;;  %vm2969_vm6 = vmmov %vm2965_vm2 }
  0x96   : > { %1960 = vmatmul.mubr.msk.bf16.gmra.mxu1 %vm1959_vm8, %v2434_v47  ;;  %1930 = vmatprep.mubr.msk.bf16.mxu0 %vm1929_vm9, %v2434_v47  ;;  %vm2972_vm8 = vmmov %vm2965_vm2 }
  0x97   : > { %1962 = vmatprep.mubr.msk.bf16.mxu1 %vm1961_vm11, %v2434_v47  ;;  %vm2973_vm9 = vmmov %vm2965_vm2 }
  0x98   : > { %vm2974_vm11 = vmmov %vm2965_vm2 }
  0x99   : > { %vm2978_vm1 = vmmov %vm2975_vm0 }
  0x9d   : > { %1932 = vmatmul.mubr.msk.bf16.gmra.mxu0 %vm1931_vm14, %v2434_v47  ;;  %vm2979_vm14 = vmmov %vm2975_vm0 }
  0x9e   : > { %1964 = vmatmul.mubr.msk.bf16.gmra.mxu1 %vm1963_vm15, %v2434_v47  ;;  %vm2980_vm15 = vmmov %vm2975_vm0 }
 0x125   : > { %v2021_v60 = vpop.f32.mrf.mxu0 }
 0x126   : > { %v2085_v61 = vpop.f32.mrf.mxu1 }
 0x127   : > { %v2022_v62 = vpop.f32.mrf.mxu0 }
 0x128   : > { %v2023_v63 = vadd.f32 %v2022_v62, %v2021_v60  ;;  %v2086_v0 = vpop.f32.mrf.mxu1 }
 0x129   : > { %v2087_v1 = vadd.f32 %v2086_v0, %v2085_v61  ;;  %v2024_v2 = vpop.f32.mrf.mxu0 }
 0x12a   : > { %v2088_v4 = vpop.f32.mrf.mxu1 }
 0x12b   : > { %v1121_v5 = vadd.f32 %v2087_v1, %v2023_v63  ;;  %v2025_v6 = vpop.f32.mrf.mxu0 }
 0x12c   : > { %v2026_v7 = vadd.f32 %v2025_v6, %v2024_v2  ;;  %v2089_v8 = vpop.f32.mrf.mxu1  ;;  %v724_v2 = vld [vmem:[#allocation2 + $0x38] sm:$0xff] }
 0x12d   : > { %v1183_v9 = vadd.f32 %v1121_v5, %v717_v3  ;;  %v2090_v10 = vadd.f32 %v2089_v8, %v2088_v4  ;;  %v2027_v11 = vpop.f32.mrf.mxu0 }
 0x12e   : > { %v2091_v13 = vpop.f32.mrf.mxu1 }
 0x12f   : > { %1200 = vst.msk [vmem:[#allocation2] sm:$0xff] %vm2965_vm2, %v1183_v9  ;;  %v1124_v14 = vadd.f32 %v2090_v10, %v2026_v7  ;;  %v2028_v15 = vpop.f32.mrf.mxu0 }
 0x130   : > { %v2029_v16 = vadd.f32 %v2028_v15, %v2027_v11  ;;  %v2092_v17 = vpop.f32.mrf.mxu1  ;;  %v725_v11 = vld [vmem:[#allocation2 + $0x40] sm:$0xff] }
 0x131   : > { %v1184_v18 = vadd.f32 %v1124_v14, %v718_v12  ;;  %v2093_v19 = vadd.f32 %v2092_v17, %v2091_v13  ;;  %v2030_v20 = vpop.f32.mrf.mxu0 }
 0x132   : > { %v2094_v22 = vpop.f32.mrf.mxu1 }
 0x133   : > { %1201 = vst.msk [vmem:[#allocation2 + $0x8] sm:$0xff] %vm2966_vm3, %v1184_v18  ;;  %v1129_v23 = vadd.f32 %v2093_v19, %v2029_v16  ;;  %v2031_v24 = vpop.f32.mrf.mxu0 }
 0x134   : > { %v2032_v25 = vadd.f32 %v2031_v24, %v2030_v20  ;;  %v2095_v26 = vpop.f32.mrf.mxu1  ;;  %v726_v20 = vld [vmem:[#allocation2 + $0x48] sm:$0xff] }
 0x135   : > { %v1185_v27 = vadd.f32 %v1129_v23, %v719_v21  ;;  %v2096_v28 = vadd.f32 %v2095_v26, %v2094_v22  ;;  %v2033_v29 = vpop.f32.mrf.mxu0 }
 0x136   : > { %v2097_v31 = vpop.f32.mrf.mxu1 }
 0x137   : > { %1202 = vst.msk [vmem:[#allocation2 + $0x10] sm:$0xff] %vm2967_vm4, %v1185_v27  ;;  %v1132_v32 = vadd.f32 %v2096_v28, %v2032_v25  ;;  %v2034_v33 = vpop.f32.mrf.mxu0 }
 0x138   : > { %v2035_v34 = vadd.f32 %v2034_v33, %v2033_v29  ;;  %v2098_v35 = vpop.f32.mrf.mxu1  ;;  %v727_v29 = vld [vmem:[#allocation2 + $0x50] sm:$0xff] }
 0x139   : > { %v1186_v36 = vadd.f32 %v1132_v32, %v720_v30  ;;  %v2099_v37 = vadd.f32 %v2098_v35, %v2097_v31  ;;  %v2036_v38 = vpop.f32.mrf.mxu0 }
 0x13a   : > { %v2100_v40 = vpop.f32.mrf.mxu1 }
 0x13b   : > { %1203 = vst.msk [vmem:[#allocation2 + $0x18] sm:$0xff] %vm2968_vm5, %v1186_v36  ;;  %v1137_v41 = vadd.f32 %v2099_v37, %v2035_v34  ;;  %v2037_v42 = vpop.f32.mrf.mxu0 }
 0x13c   : > { %v2038_v43 = vadd.f32 %v2037_v42, %v2036_v38  ;;  %v2101_v44 = vpop.f32.mrf.mxu1  ;;  %v728_v38 = vld [vmem:[#allocation2 + $0x58] sm:$0xff] }
 0x13d   : > { %v1187_v45 = vadd.f32 %v1137_v41, %v721_v39  ;;  %v2102_v46 = vadd.f32 %v2101_v44, %v2100_v40  ;;  %v2039_v47 = vpop.f32.mrf.mxu0 }
 0x13e   : > { %v2103_v49 = vpop.f32.mrf.mxu1 }
 0x13f   : > { %1204 = vst.msk [vmem:[#allocation2 + $0x20] sm:$0xff] %vm2969_vm6, %v1187_v45  ;;  %v1140_v50 = vadd.f32 %v2102_v46, %v2038_v43  ;;  %v2040_v51 = vpop.f32.mrf.mxu0 }
 0x140   : > { %v2041_v52 = vadd.f32 %v2040_v51, %v2039_v47  ;;  %v2104_v53 = vpop.f32.mrf.mxu1  ;;  %v729_v47 = vld [vmem:[#allocation2 + $0x60] sm:$0xff] }
 0x141   : > { %v1188_v54 = vadd.f32 %v1140_v50, %v722_v48  ;;  %v2105_v55 = vadd.f32 %v2104_v53, %v2103_v49  ;;  %v2042_v56 = vpop.f32.mrf.mxu0 }
 0x142   : > { %v2106_v58 = vpop.f32.mrf.mxu1 }
 0x143   : > { %1205 = vst.msk [vmem:[#allocation2 + $0x28] sm:$0xff] %vm2970_vm7, %v1188_v54  ;;  %v1145_v59 = vadd.f32 %v2105_v55, %v2041_v52  ;;  %v2043_v60 = vpop.f32.mrf.mxu0 }
 0x144   : > { %v2044_v61 = vadd.f32 %v2043_v60, %v2042_v56  ;;  %v2107_v62 = vpop.f32.mrf.mxu1  ;;  %v730_v56 = vld [vmem:[#allocation2 + $0x68] sm:$0xff] }
 0x145   : > { %v1189_v63 = vadd.f32 %v1145_v59, %v723_v57  ;;  %v2108_v0 = vadd.f32 %v2107_v62, %v2106_v58  ;;  %v2045_v1 = vpop.f32.mrf.mxu0 }
 0x146   : > { %v2109_v3 = vpop.f32.mrf.mxu1 }
 0x147   : > { %1206 = vst.msk [vmem:[#allocation2 + $0x30] sm:$0xff] %vm2971_vm10, %v1189_v63  ;;  %v1148_v4 = vadd.f32 %v2108_v0, %v2044_v61  ;;  %v2046_v5 = vpop.f32.mrf.mxu0 }
 0x148   : > { %v2047_v6 = vadd.f32 %v2046_v5, %v2045_v1  ;;  %v2110_v7 = vpop.f32.mrf.mxu1  ;;  %v731_v1 = vld [vmem:[#allocation2 + $0x70] sm:$0xff] }
 0x149   : > { %v1190_v8 = vadd.f32 %v1148_v4, %v724_v2  ;;  %v2111_v9 = vadd.f32 %v2110_v7, %v2109_v3  ;;  %v2048_v10 = vpop.f32.mrf.mxu0 }
 0x14a   : > { %v2112_v12 = vpop.f32.mrf.mxu1 }
 0x14b   : > { %1207 = vst.msk [vmem:[#allocation2 + $0x38] sm:$0xff] %vm2972_vm8, %v1190_v8  ;;  %v1153_v13 = vadd.f32 %v2111_v9, %v2047_v6  ;;  %v2049_v14 = vpop.f32.mrf.mxu0  ;;  %v732_v9 = vld [vmem:[#allocation2 + $0x78] sm:$0xff] }
 0x14c   : > { %v2050_v15 = vadd.f32 %v2049_v14, %v2048_v10  ;;  %v2113_v16 = vpop.f32.mrf.mxu1 }
 0x14d   : > { %v1191_v17 = vadd.f32 %v1153_v13, %v725_v11  ;;  %v2114_v18 = vadd.f32 %v2113_v16, %v2112_v12  ;;  %v2051_v19 = vpop.f32.mrf.mxu0 }
 0x14e   : > { %v2115_v21 = vpop.f32.mrf.mxu1 }
 0x14f   : > { %1208 = vst.msk [vmem:[#allocation2 + $0x40] sm:$0xff] %vm2973_vm9, %v1191_v17  ;;  %v1156_v22 = vadd.f32 %v2114_v18, %v2050_v15  ;;  %v2052_v23 = vpop.f32.mrf.mxu0 }
 0x150   : > { %v2053_v24 = vadd.f32 %v2052_v23, %v2051_v19  ;;  %v2116_v25 = vpop.f32.mrf.mxu1 }
 0x151   : > { %v1192_v26 = vadd.f32 %v1156_v22, %v726_v20  ;;  %v2117_v27 = vadd.f32 %v2116_v25, %v2115_v21  ;;  %v2054_v28 = vpop.f32.mrf.mxu0 }
 0x152   : > { %v2118_v30 = vpop.f32.mrf.mxu1 }
 0x153   : > { %1209 = vst.msk [vmem:[#allocation2 + $0x48] sm:$0xff] %vm2974_vm11, %v1192_v26  ;;  %v1161_v31 = vadd.f32 %v2117_v27, %v2053_v24  ;;  %v2055_v32 = vpop.f32.mrf.mxu0 }
 0x154   : > { %v2056_v33 = vadd.f32 %v2055_v32, %v2054_v28  ;;  %v2119_v34 = vpop.f32.mrf.mxu1 }
 0x155   : > { %v1193_v35 = vadd.f32 %v1161_v31, %v727_v29  ;;  %v2120_v36 = vadd.f32 %v2119_v34, %v2118_v30  ;;  %v2057_v37 = vpop.f32.mrf.mxu0 }
 0x156   : > { %v2121_v39 = vpop.f32.mrf.mxu1 }
 0x157   : > { %1210 = vst.msk [vmem:[#allocation2 + $0x50] sm:$0xff] %vm2975_vm0, %v1193_v35  ;;  %v1164_v40 = vadd.f32 %v2120_v36, %v2056_v33  ;;  %v2058_v41 = vpop.f32.mrf.mxu0 }
 0x158   : > { %v2059_v42 = vadd.f32 %v2058_v41, %v2057_v37  ;;  %v2122_v43 = vpop.f32.mrf.mxu1 }
 0x159   : > { %v1194_v44 = vadd.f32 %v1164_v40, %v728_v38  ;;  %v2123_v45 = vadd.f32 %v2122_v43, %v2121_v39  ;;  %v2060_v46 = vpop.f32.mrf.mxu0 }
 0x15a   : > { %v2124_v48 = vpop.f32.mrf.mxu1 }
 0x15b   : > { %1211 = vst.msk [vmem:[#allocation2 + $0x58] sm:$0xff] %vm2976_vm12, %v1194_v44  ;;  %v1169_v49 = vadd.f32 %v2123_v45, %v2059_v42  ;;  %v2061_v50 = vpop.f32.mrf.mxu0 }
 0x15c   : > { %v2062_v51 = vadd.f32 %v2061_v50, %v2060_v46  ;;  %v2125_v52 = vpop.f32.mrf.mxu1 }
 0x15d   : > { %v1195_v53 = vadd.f32 %v1169_v49, %v729_v47  ;;  %v2126_v54 = vadd.f32 %v2125_v52, %v2124_v48  ;;  %v2063_v55 = vpop.f32.mrf.mxu0 }
 0x15e   : > { %v2127_v57 = vpop.f32.mrf.mxu1 }
 0x15f   : > { %1212 = vst.msk [vmem:[#allocation2 + $0x60] sm:$0xff] %vm2977_vm13, %v1195_v53  ;;  %v1172_v58 = vadd.f32 %v2126_v54, %v2062_v51  ;;  %v2064_v59 = vpop.f32.mrf.mxu0 }
 0x160   : > { %v2065_v60 = vadd.f32 %v2064_v59, %v2063_v55  ;;  %v2128_v61 = vpop.f32.mrf.mxu1 }
 0x161   : > { %v1196_v62 = vadd.f32 %v1172_v58, %v730_v56  ;;  %v2129_v63 = vadd.f32 %v2128_v61, %v2127_v57  ;;  %v2066_v0 = vpop.f32.mrf.mxu0 }
 0x162   : > { %v2130_v2 = vpop.f32.mrf.mxu1 }
 0x163   : > { %1213 = vst.msk [vmem:[#allocation2 + $0x68] sm:$0xff] %vm2978_vm1, %v1196_v62  ;;  %v1177_v3 = vadd.f32 %v2129_v63, %v2065_v60  ;;  %v2067_v4 = vpop.f32.mrf.mxu0 }
 0x164   : > { %v2068_v5 = vadd.f32 %v2067_v4, %v2066_v0  ;;  %v2131_v6 = vpop.f32.mrf.mxu1 }
 0x165   : > { %v1197_v7 = vadd.f32 %v1177_v3, %v731_v1  ;;  %v2132_v8 = vadd.f32 %v2131_v6, %v2130_v2 }
 0x167   : > { %1214 = vst.msk [vmem:[#allocation2 + $0x70] sm:$0xff] %vm2979_vm14, %v1197_v7  ;;  %v1180_v10 = vadd.f32 %v2132_v8, %v2068_v5 }
 0x169   : > { %v1198_v11 = vadd.f32 %v1180_v10, %v732_v9 }
 0x16b   : > { %1215 = vst.msk [vmem:[#allocation2 + $0x78] sm:$0xff] %vm2980_vm15, %v1198_v11 }
 0x16c PF: > { %v1253_v12 = vld [vmem:[%s2939_s5 + $0x10] sm:$0xff]  ;;  %v1252_v13 = vld [vmem:[%s2939_s5 + $0x8] sm:$0xff]  ;;  %vm1254_vm2 = vcmask 195584   ;;  %v1235_v14 = vld [vmem:[%s2587_s17] sm:$0xff]  ;;  %vm2981_vm3 = vcmask 261120   ;;  %s2004_s15 = sshll.u32 %s2421_s20, 11 }
 0x16d   : > { %2172 = vmatprep.subr.mxu0 %v1253_v12  ;;  %v1251_v15 = vld [vmem:[%s2939_s5] sm:$0xff]  ;;  %2178 = vmatprep.mubr.msk.f32.mxu0 %vm1254_vm2, %v1235_v14  ;;  %v1236_v16 = vld [vmem:[%s2587_s17 + $0x8] sm:$0xff]  ;;  %v1237_v17 = vld [vmem:[%s2587_s17 + $0x10] sm:$0xff]  ;;  %s2997_s19 = sld [smem:[#allocation17_spill]]  ;;  %s2999_s22 = sand.u32 1, %s2413_s18  }
 0x16e   : > { %2173 = vmatpush3.msra.mxu0 %v1253_v12  ;;  %v1238_v18 = vld [vmem:[%s2587_s17 + $0x18] sm:$0xff]  ;;  %v1239_v19 = vld [vmem:[%s2587_s17 + $0x20] sm:$0xff]  ;;  %v1240_v20 = vld [vmem:[%s2587_s17 + $0x28] sm:$0xff]  ;;  %s2890_s20 = scalar_lea.sflag [#allocation7], %s2999_s22  ;;  %s2435_s30 = smov [#allocation6]  }
 0x16f   : > { %2174 = vmatprep.subr.mxu0 %v1252_v13  ;;  %v1241_v21 = vld [vmem:[%s2587_s17 + $0x30] sm:$0xff]  ;;  %v1242_v22 = vld [vmem:[%s2587_s17 + $0x38] sm:$0xff]  ;;  %v1243_v23 = vld [vmem:[%s2587_s17 + $0x40] sm:$0xff]  ;;  %s2355_s10 = sshll.u32 %s2435_s30, 4  ;;  %s2356_s10 = int_to_ptr.vmem [resolvable:$false] %s2355_s10 }
 0x170   : > { %2175 = vmatpush3.msra.mxu0 %v1252_v13  ;;  %v1244_v24 = vld [vmem:[%s2587_s17 + $0x48] sm:$0xff]  ;;  %v1245_v25 = vld [vmem:[%s2587_s17 + $0x50] sm:$0xff]  ;;  %v1246_v26 = vld [vmem:[%s2587_s17 + $0x58] sm:$0xff]  ;;  %s2357_s12 = scalar_lea.vmem %s2356_s10, 4096 }
 0x171   : > { %2176 = vmatprep.subr.mxu0 %v1251_v15  ;;  %v1247_v27 = vld [vmem:[%s2587_s17 + $0x60] sm:$0xff]  ;;  %v1248_v28 = vld [vmem:[%s2587_s17 + $0x68] sm:$0xff]  ;;  %v1249_v29 = vld [vmem:[%s2587_s17 + $0x70] sm:$0xff] }
 0x172   : > { %2177 = vmatpush3.msra.mxu0 %v1251_v15  ;;  %v1250_v30 = vld [vmem:[%s2587_s17 + $0x78] sm:$0xff]  ;;  %v1505_v32 = vld [vmem:[%s2941_s7 + $0x10] sm:$0xff]  ;;  %v1504_v33 = vld [vmem:[%s2941_s7 + $0x8] sm:$0xff]  ;;  %s1738_s17 = sshll.u32 %s2590_s14, 4  ;;  %s2884_s17 = int_to_ptr.vmem [resolvable:$true] %s1738_s17 }
 0x173   : > { %2179 = vmatmul.mubr.msk.f32.vlgmr.msra.gmra.mxu0 %vm1254_vm2, %v1236_v16  ;;  %v1506_v31 = vld [vmem:[%s2941_s7 + $0x18] sm:$0xff]  ;;  %v1503_v34 = vld [vmem:[%s2941_s7] sm:$0xff]  ;;  %v1220_v35 = vld [vmem:[#allocation2 + $0x8] sm:$0xff]  ;;  %s2998_s25 = smov %s2997_s19  ;;  %s2882_s21 = scalar_lea.hbm %s2997_s19, %s2004_s15 }
 0x174   : > { %2181 = vmatprep.mubr.msk.f32.mxu0 %vm1254_vm2, %v1237_v17  ;;  %2202 = vmatprep.subr.mxu1 %v1506_v31  ;;  %v1219_v37 = vld [vmem:[#allocation2] sm:$0xff]  ;;  %v1222_v41 = vld [vmem:[#allocation2 + $0x18] sm:$0xff]  ;;  %v1221_v45 = vld [vmem:[#allocation2 + $0x10] sm:$0xff]  ;;  %s2351_s29 = scalar_lea.vmem %s2884_s17, 2048  ;;  %p2358_p2 = scmp.lt.s32.totalorder %s2884_s17, %s2356_s10 }
 0x175   : > { %2203 = vmatpush3.msra.mxu1 %v1506_v31  ;;  %v2826_v39 = vld [vmem:[%s2940_s6] ss:$0 sm:$0xff]  ;;  %v1224_v49 = vld [vmem:[#allocation2 + $0x28] sm:$0xff]  ;;  %vm2982_vm4 = vmmov %vm2981_vm3  ;;  %p2352_p12 = scmp.ne.s32.totalorder %s2884_s17, %s2351_s29  ;;  %p2359_p3 = scmp.lt.s32.totalorder %s2357_s12, %s2351_s29 }
 0x176   : > { %2204 = vmatprep.subr.mxu1 %v1505_v32  ;;  %v1223_v55 = vld [vmem:[#allocation2 + $0x20] sm:$0xff]  ;;  %v1226_v59 = vld [vmem:[#allocation2 + $0x38] sm:$0xff]  ;;  %v1225_v1 = vld [vmem:[#allocation2 + $0x30] sm:$0xff] }
 0x177   : > { %2182 = vmatmul.mubr.msk.f32.gmra.mxu0 %vm1254_vm2, %v1238_v18  ;;  %2205 = vmatpush3.msra.mxu1 %v1505_v32  ;;  %vm2983_vm5 = vmmov %vm2981_vm3  ;;  %v1228_v5 = vld [vmem:[#allocation2 + $0x48] sm:$0xff]  ;;  %v1227_v11 = vld [vmem:[#allocation2 + $0x40] sm:$0xff]  ;;  %p2353_p13 = pnand %p2352_p12, %p2534_p0  ;;  %p2360_p5 = por %p2359_p3, %p2358_p2 }
 0x178   : > { %2184 = vmatprep.mubr.msk.f32.mxu0 %vm1254_vm2, %v1239_v19  ;;  %2206 = vmatprep.subr.mxu1 %v1504_v33  ;;  %vm2984_vm6 = vmmov %vm2981_vm3  ;;  %v1230_v15 = vld [vmem:[#allocation2 + $0x58] sm:$0xff]  ;;  %v1231_v31 = vld [vmem:[#allocation2 + $0x60] sm:$0xff] }
 0x179   : > { %2207 = vmatpush3.msra.mxu1 %v1504_v33  ;;  %vm2985_vm7 = vmmov %vm2981_vm3  ;;  %p2354_p1 = pneg %p2353_p13 }
 0x17a   : > { %2208 = vmatprep.subr.mxu1 %v1503_v34  ;;  %vm2986_vm10 = vmmov %vm2981_vm3 }
 0x17b   : > { %2185 = vmatmul.mubr.msk.f32.gmra.mxu0 %vm1254_vm2, %v1240_v20  ;;  %2209 = vmatpush3.msra.mxu1 %v1503_v34  ;;  %vm2987_vm8 = vmmov %vm2981_vm3  ;;  %p2361_p6 = pnand %p2360_p5, %p2354_p1 }
 0x17c   : > { %2187 = vmatprep.mubr.msk.f32.mxu0 %vm1254_vm2, %v1241_v21  ;;  %v1229_v21 = vld [vmem:[#allocation2 + $0x50] sm:$0xff]  ;;  %vm2988_vm9 = vmmov %vm2981_vm3 }
 0x17d   : > { %vm2989_vm11 = vmmov %vm2981_vm3 }
 0x17e   : > { %vm2990_vm0 = vmmov %vm2981_vm3 }
 0x17f   : > { %2188 = vmatmul.mubr.msk.f32.gmra.mxu0 %vm1254_vm2, %v1242_v22  ;;  %vm2991_vm12 = vmmov %vm2990_vm0 }
 0x180   : > { %2190 = vmatprep.mubr.msk.f32.mxu0 %vm1254_vm2, %v1243_v23  ;;  %vm2992_vm13 = vmmov %vm2990_vm0 }
 0x181   : > { %vm2993_vm1 = vmmov %vm2990_vm0 }
 0x182   : > { %vm2994_vm14 = vmmov %vm2990_vm0 }
 0x183   : > { %2191 = vmatmul.mubr.msk.f32.gmra.mxu0 %vm1254_vm2, %v1244_v24  ;;  %vm2995_vm15 = vmmov %vm2990_vm0 }
 0x184   : > { %2193 = vmatprep.mubr.msk.f32.mxu0 %vm1254_vm2, %v1245_v25  ;;  %v1232_v25 = vld [vmem:[#allocation2 + $0x68] sm:$0xff] }
 0x187   : > { %2194 = vmatmul.mubr.msk.f32.gmra.mxu0 %vm1254_vm2, %v1246_v26 }
 0x188   : > { %2196 = vmatprep.mubr.msk.f32.mxu0 %vm1254_vm2, %v1247_v27 }
 0x18b   : > { %2197 = vmatmul.mubr.msk.f32.gmra.mxu0 %vm1254_vm2, %v1248_v28 }
 0x18c   : > { %2199 = vmatprep.mubr.msk.f32.mxu0 %vm1254_vm2, %v1249_v29 }
 0x18f   : > { %2200 = vmatmul.mubr.msk.f32.gmra.mxu0 %vm1254_vm2, %v1250_v30  ;;  %vm2996_vm2 = vmmov %vm2990_vm0 }
 0x233   : > { %v2180_v36 = vpop.f32.mrf.mxu0 }
 0x234   : > { %v1449_v38 = vadd.f32 %v2180_v36, %v1220_v35  ;;  %v1234_v35 = vld [vmem:[#allocation2 + $0x78] sm:$0xff] }
 0x235   : > { %v1369_v40 = vpop.f32.mrf.mxu0 }
 0x236   : > { %v1448_v42 = vadd.f32 %v1369_v40, %v1219_v37  ;;  %v1472_v43 = vadd.f32 %v2826_v39, %v1449_v38 }
 0x237   : > { %v2183_v44 = vpop.f32.mrf.mxu0 }
 0x238   : > { %v1451_v46 = vadd.f32 %v2183_v44, %v1222_v41  ;;  %v1471_v47 = vadd.f32 %v2826_v39, %v1448_v42  ;;  %v1488_v52 = vmax.f32 %v1472_v43, 0.0  ;;  %v1233_v42 = vld [vmem:[#allocation2 + $0x70] sm:$0xff] }
 0x239   : > { %v1379_v48 = vpop.f32.mrf.mxu0 }
 0x23a   : > { %v1450_v50 = vadd.f32 %v1379_v48, %v1221_v45  ;;  %v1487_v51 = vmax.f32 %v1471_v47, 0.0  ;;  %v1474_v53 = vadd.f32 %v2826_v39, %v1451_v46 }
 0x23b   : > { %v2186_v54 = vpop.f32.mrf.mxu0 }
 0x23c   : > { %v1473_v56 = vadd.f32 %v2826_v39, %v1450_v50  ;;  %v1453_v57 = vadd.f32 %v2186_v54, %v1224_v49  ;;  %2210 = vmatprep.mubr.msk.f32.mxu1 %vm2981_vm3, %v1487_v51  ;;  %v1490_v62 = vmax.f32 %v1474_v53, 0.0  ;;  %v1982_v53 = vld [vmem:[%s2942_s8] ss:$0 sm:$0xff] }
 0x23d   : > { %v1389_v58 = vpop.f32.mrf.mxu0  ;;  %2211 = vmatmul.mubr.msk.f32.vlgmr.msra.gmra.mxu1 %vm2982_vm4, %v1488_v52 }
 0x23e   : > { %v1489_v60 = vmax.f32 %v1473_v56, 0.0  ;;  %v1452_v61 = vadd.f32 %v1389_v58, %v1223_v55  ;;  %v1476_v63 = vadd.f32 %v2826_v39, %v1453_v57 }
 0x23f   : > { %v2189_v0 = vpop.f32.mrf.mxu0 }
 0x240   : > { %v1475_v2 = vadd.f32 %v2826_v39, %v1452_v61  ;;  %v1455_v3 = vadd.f32 %v2189_v0, %v1226_v59  ;;  %2213 = vmatprep.mubr.msk.f32.mxu1 %vm2983_vm5, %v1489_v60  ;;  %v1492_v8 = vmax.f32 %v1476_v63, 0.0 }
 0x241   : > { %v1399_v4 = vpop.f32.mrf.mxu0  ;;  %2214 = vmatmul.mubr.msk.f32.gmra.mxu1 %vm2984_vm6, %v1490_v62 }
 0x242   : > { %v1491_v6 = vmax.f32 %v1475_v2, 0.0  ;;  %v1454_v7 = vadd.f32 %v1399_v4, %v1225_v1  ;;  %v1478_v9 = vadd.f32 %v2826_v39, %v1455_v3 }
 0x243   : > { %v2192_v10 = vpop.f32.mrf.mxu0 }
 0x244   : > { %v1477_v12 = vadd.f32 %v2826_v39, %v1454_v7  ;;  %v1457_v13 = vadd.f32 %v2192_v10, %v1228_v5  ;;  %2216 = vmatprep.mubr.msk.f32.mxu1 %vm2985_vm7, %v1491_v6  ;;  %v1494_v18 = vmax.f32 %v1478_v9, 0.0 }
 0x245   : > { %v1409_v14 = vpop.f32.mrf.mxu0  ;;  %2217 = vmatmul.mubr.msk.f32.gmra.mxu1 %vm2986_vm10, %v1492_v8 }
 0x246   : > { %v1493_v16 = vmax.f32 %v1477_v12, 0.0  ;;  %v1456_v17 = vadd.f32 %v1409_v14, %v1227_v11  ;;  %v1480_v19 = vadd.f32 %v2826_v39, %v1457_v13 }
 0x247   : > { %v2195_v20 = vpop.f32.mrf.mxu0 }
 0x248   : > { %v1479_v22 = vadd.f32 %v2826_v39, %v1456_v17  ;;  %v1459_v23 = vadd.f32 %v2195_v20, %v1230_v15  ;;  %2219 = vmatprep.mubr.msk.f32.mxu1 %vm2987_vm8, %v1493_v16  ;;  %v1496_v28 = vmax.f32 %v1480_v19, 0.0 }
 0x249   : > { %v1419_v24 = vpop.f32.mrf.mxu0  ;;  %2220 = vmatmul.mubr.msk.f32.gmra.mxu1 %vm2988_vm9, %v1494_v18 }
 0x24a   : > { %v1495_v26 = vmax.f32 %v1479_v22, 0.0  ;;  %v1458_v27 = vadd.f32 %v1419_v24, %v1229_v21  ;;  %v1482_v29 = vadd.f32 %v2826_v39, %v1459_v23 }
 0x24b   : > { %v2198_v30 = vpop.f32.mrf.mxu0 }
 0x24c   : > { %v1481_v32 = vadd.f32 %v2826_v39, %v1458_v27  ;;  %v1461_v33 = vadd.f32 %v2198_v30, %v1232_v25  ;;  %2222 = vmatprep.mubr.msk.f32.mxu1 %vm2989_vm11, %v1495_v26  ;;  %v1498_v38 = vmax.f32 %v1482_v29, 0.0 }
 0x24d   : > { %v1429_v34 = vpop.f32.mrf.mxu0  ;;  %2223 = vmatmul.mubr.msk.f32.gmra.mxu1 %vm2990_vm0, %v1496_v28 }
 0x24e   : > { %v1497_v36 = vmax.f32 %v1481_v32, 0.0  ;;  %v1460_v37 = vadd.f32 %v1429_v34, %v1231_v31  ;;  %v1484_v40 = vadd.f32 %v2826_v39, %v1461_v33 }
 0x24f   : > { %v2201_v41 = vpop.f32.mrf.mxu0 }
 0x250   : > { %v1483_v43 = vadd.f32 %v2826_v39, %v1460_v37  ;;  %v1463_v44 = vadd.f32 %v2201_v41, %v1234_v35  ;;  %2225 = vmatprep.mubr.msk.f32.mxu1 %vm2991_vm12, %v1497_v36  ;;  %v1500_v48 = vmax.f32 %v1484_v40, 0.0 }
 0x251   : > { %v1439_v45 = vpop.f32.mrf.mxu0  ;;  %2226 = vmatmul.mubr.msk.f32.gmra.mxu1 %vm2992_vm13, %v1498_v38 }
 0x252   : > { %v1499_v46 = vmax.f32 %v1483_v43, 0.0  ;;  %v1462_v47 = vadd.f32 %v1439_v45, %v1233_v42  ;;  %v1486_v49 = vadd.f32 %v2826_v39, %v1463_v44 }
 0x254   : > { %v1485_v50 = vadd.f32 %v2826_v39, %v1462_v47  ;;  %2228 = vmatprep.mubr.msk.f32.mxu1 %vm2993_vm1, %v1499_v46  ;;  %v1502_v52 = vmax.f32 %v1486_v49, 0.0 }
 0x255   : > { %2229 = vmatmul.mubr.msk.f32.gmra.mxu1 %vm2994_vm14, %v1500_v48 }
 0x256   : > { %v1501_v51 = vmax.f32 %v1485_v50, 0.0 }
 0x258   : > { %2231 = vmatprep.mubr.msk.f32.mxu1 %vm2995_vm15, %v1501_v51 }
 0x259   : > { %2232 = vmatmul.mubr.msk.f32.gmra.mxu1 %vm2996_vm2, %v1502_v52 }
 0x2fd   : > { %v2212_v54 = vpop.f32.mrf.mxu1 }
 0x2fe   : > { %v1635_v55 = vadd.f32 %v2212_v54, %v1982_v53 }
 0x2ff   : > { %v1629_v39 = vpop.f32.mrf.mxu1 }
 0x300   : > { %1709 = vst [vmem:[%s2590_s14 + $0x8] sm:$0xff] %v1635_v55  ;;  %v1630_v56 = vadd.f32 %v1982_v53, %v1629_v39 }
 0x301   : > { %v2215_v57 = vpop.f32.mrf.mxu1 }
 0x302   : > { %1708 = vst [vmem:[%s2590_s14] sm:$0xff] %v1630_v56  ;;  %v1645_v58 = vadd.f32 %v2215_v57, %v1982_v53 }
 0x303   : > { %v1639_v59 = vpop.f32.mrf.mxu1 }
 0x304   : > { %1711 = vst [vmem:[%s2590_s14 + $0x18] sm:$0xff] %v1645_v58  ;;  %v1640_v60 = vadd.f32 %v1982_v53, %v1639_v59 }
 0x305   : > { %v2218_v61 = vpop.f32.mrf.mxu1 }
 0x306   : > { %1710 = vst [vmem:[%s2590_s14 + $0x10] sm:$0xff] %v1640_v60  ;;  %v1655_v62 = vadd.f32 %v2218_v61, %v1982_v53 }
 0x307   : > { %v1649_v63 = vpop.f32.mrf.mxu1 }
 0x308   : > { %1713 = vst [vmem:[%s2590_s14 + $0x28] sm:$0xff] %v1655_v62  ;;  %v1650_v0 = vadd.f32 %v1982_v53, %v1649_v63 }
 0x309   : > { %v2221_v1 = vpop.f32.mrf.mxu1 }
 0x30a   : > { %1712 = vst [vmem:[%s2590_s14 + $0x20] sm:$0xff] %v1650_v0  ;;  %v1665_v2 = vadd.f32 %v2221_v1, %v1982_v53 }
 0x30b   : > { %v1659_v3 = vpop.f32.mrf.mxu1 }
 0x30c   : > { %1715 = vst [vmem:[%s2590_s14 + $0x38] sm:$0xff] %v1665_v2  ;;  %v1660_v4 = vadd.f32 %v1982_v53, %v1659_v3 }
 0x30d   : > { %v2224_v5 = vpop.f32.mrf.mxu1 }
 0x30e   : > { %1714 = vst [vmem:[%s2590_s14 + $0x30] sm:$0xff] %v1660_v4  ;;  %v1675_v6 = vadd.f32 %v2224_v5, %v1982_v53 }
 0x30f   : > { %v1669_v7 = vpop.f32.mrf.mxu1 }
 0x310   : > { %1717 = vst [vmem:[%s2590_s14 + $0x48] sm:$0xff] %v1675_v6  ;;  %v1670_v8 = vadd.f32 %v1982_v53, %v1669_v7 }
 0x311   : > { %v2227_v9 = vpop.f32.mrf.mxu1 }
 0x312   : > { %1716 = vst [vmem:[%s2590_s14 + $0x40] sm:$0xff] %v1670_v8  ;;  %v1685_v10 = vadd.f32 %v2227_v9, %v1982_v53 }
 0x313   : > { %v1679_v11 = vpop.f32.mrf.mxu1 }
 0x314   : > { %1719 = vst [vmem:[%s2590_s14 + $0x58] sm:$0xff] %v1685_v10  ;;  %v1680_v12 = vadd.f32 %v1982_v53, %v1679_v11 }
 0x315   : > { %v2230_v13 = vpop.f32.mrf.mxu1 }
 0x316   : > { %1718 = vst [vmem:[%s2590_s14 + $0x50] sm:$0xff] %v1680_v12  ;;  %v1695_v14 = vadd.f32 %v2230_v13, %v1982_v53 }
 0x317   : > { %v1689_v15 = vpop.f32.mrf.mxu1 }
 0x318   : > { %1721 = vst [vmem:[%s2590_s14 + $0x68] sm:$0xff] %v1695_v14  ;;  %v1690_v16 = vadd.f32 %v1982_v53, %v1689_v15 }
 0x319   : > { %v2233_v17 = vpop.f32.mrf.mxu1 }
 0x31a   : > { %1720 = vst [vmem:[%s2590_s14 + $0x60] sm:$0xff] %v1690_v16  ;;  %v1705_v18 = vadd.f32 %v2233_v17, %v1982_v53 }
 0x31b   : > { %v1699_v19 = vpop.f32.mrf.mxu1 }
 0x31c   : > { %1723 = vst [vmem:[%s2590_s14 + $0x78] sm:$0xff] %v1705_v18  ;;  %v1700_v20 = vadd.f32 %v1982_v53, %v1699_v19 }
 0x31e   : > { %1722 = vst [vmem:[%s2590_s14 + $0x70] sm:$0xff] %v1700_v20 }
 0x31f   : > { %2364 = shalt.err (!%p2361_p6)
}
 0x320   : > { %s2365_s14 = scalar_lea.hbm %s2882_s21, 2048  ;;  %s2369_s23 = scalar_lea.hbm %s2998_s25, 4096 }
 0x321   : > { %p2366_p7 = scmp.ne.s32.totalorder %s2882_s21, %s2365_s14  ;;  %p2370_p10 = scmp.lt.s32.totalorder %s2882_s21, %s2998_s25 }
 0x322   : > { %p2371_p11 = scmp.lt.s32.totalorder %s2369_s23, %s2365_s14 }
 0x323   : > { %p2367_p8 = pnand %p2366_p7, %p2534_p0 }
 0x324   : > { %p2372_p12 = por %p2371_p11, %p2370_p10 }
 0x325   : > { %p2368_p9 = pneg %p2367_p8 }
 0x327   : > { %p2373_p13 = pnand %p2372_p12, %p2368_p9 }
 0x329   : > { %2376 = shalt.err (!%p2373_p13)
}
 0x32a   : > { %s2436_s28 = smov 128   ;;  %s2437_s11 = smov 8  }
 0x32b   : > { %2234 = dma.vmem_to_hbm [thread:$0]  (%p2534_p0), %s2884_s17, 2048, %s2882_s21, %s2890_s20, %s2436_s28, %s2436_s28, %s2437_s11  }
 0x32c PF: > { %s3000_s13 = sld [smem:[#allocation13_spill]] }
 0x32d   : > { %s3001_s15 = sld [smem:[#allocation10_spill]] }
 0x332   : > { %p2240_p1 = scmp.ge.s32.totalorder %s3000_s13, 2 }
 0x333   : > { %s1753_s1 = sand.u32 1, %s3001_s15  }
 0x334   : > { %p2237_p2 = pnand %p2240_p1, %p2541_p4  ;;  %s1754_s19 = scalar_lea.sflag [#allocation7], %s1753_s1 }
 0x336   : > { %p2238_p3 = pneg %p2237_p2 }
 0x338   : > { %2404 = dma.done.wait (%p2238_p3), %s1754_s19, 2048  }
 0x339   : > { %2406 = vsyncadd (%p2238_p3), %s1754_s19, 4294965248  ;;  %s32_s22 = sadd.s32 1, %s3000_s13   ;;  %s3003_s29 = sld [smem:[#allocation11_spill]] }
 0x33a   : > { %p29_p5 = scmp.ge.s32.totalorder %s32_s22, 4   ;;  %s3004_s19 = sld [smem:[#allocation16_spill]] }
 0x33b   : > { %s3005_s20 = sld [smem:[#allocation12_spill]]  ;;  %s3007_s1 = smov %s2413_s18 }
 0x33c   : > { %s3006_s21 = sld [smem:[#allocation14_spill]]  ;;  %31 = sbr.rel (!%p29_p5) target bundleno = 30 (0x1e), region = 101 }
 0x33f   : > { %s3008_s18 = smov %s3003_s29 }
 0x341   :  { %1759 = vsyncpa [#allocation7], 1 }
 0x342   :  { %1761 = vsyncpa [#allocation7 + $0x1], 1 }

</bundles_post_ra>
